<compile_context>
chip_gen: v7x
topology: tpu7x:2x2x1
jax: 0.10.0
libtpu: 0.0.40
codegen_flags: <defaults>
</compile_context>

<pallas_src>
import math
import numpy as np
import jax
import jax.numpy as jnp
from jax import lax
from jax.experimental import pallas as pl
from jax.experimental.pallas import tpu as pltpu

EPS = 1e-5  # nn.BatchNorm2d default eps


# --------------------------- host-side helpers ------------------------------

def conv_w(key, kh, kw, cin, cout):
    # m.weight.data.normal_(0, sqrt(2 / (kh*kw*cout)))
    n = kh * kw * cout
    return jax.random.normal(key, (kh, kw, cin, cout), jnp.float32) * math.sqrt(2.0 / n)


def bn_affine(c, c_pad):
    # inference-mode BN (gamma=1, beta=0, mean=0, var=1), zero-padded to c_pad
    s = np.zeros((1, c_pad), np.float32)
    s[0, :c] = 1.0 / math.sqrt(1.0 + EPS)
    b = np.zeros((1, c_pad), np.float32)
    return jnp.asarray(s), jnp.asarray(b)


def pad_cols(w, n_cols):
    w = np.asarray(w, np.float32)
    out = np.zeros((w.shape[0], n_cols), np.float32)
    out[:, : w.shape[1]] = w
    return out


def pad_rows(w, n_rows):
    w = np.asarray(w, np.float32)
    out = np.zeros((n_rows, w.shape[1]), np.float32)
    out[: w.shape[0], :] = w
    return out


def avgpool2_matrix(h, w):
    """(h//2*w//2, h*w) f32 matrix implementing avg_pool2d(kernel=2, stride=2)."""
    ho, wo = h // 2, w // 2
    p = np.zeros((ho * wo, h * w), np.float32)
    for i in range(ho):
        for j in range(wo):
            for di in range(2):
                for dj in range(2):
                    p[i * wo + j, (2 * i + di) * w + (2 * j + dj)] = 0.25
    return jnp.asarray(p)


def global_avg_matrix(n, hw):
    """(n, n*hw) block-diagonal per-image mean matrix."""
    p = np.zeros((n, n * hw), np.float32)
    for i in range(n):
        p[i, i * hw:(i + 1) * hw] = 1.0 / hw
    return jnp.asarray(p)


def _tap_offsets():
    return [(i - 1, j - 1) for i in range(3) for j in range(3)]


def im2col(x, kh, kw, stride, pad):
    """x: (N, H, W, C) -> (N, Ho*Wo, kh*kw*C) patch matrix (layout glue only)."""
    n, h, w, c = x.shape
    xp = jnp.pad(x, ((0, 0), (pad, pad), (pad, pad), (0, 0)))
    ho = (h + 2 * pad - kh) // stride + 1
    wo = (w + 2 * pad - kw) // stride + 1
    cols = []
    for i in range(kh):
        for j in range(kw):
            v = lax.slice(
                xp, (0, i, j, 0),
                (n, i + stride * (ho - 1) + 1, j + stride * (wo - 1) + 1, c),
                (1, stride, stride, 1))
            cols.append(v)
    return jnp.concatenate(cols, axis=-1).reshape(n, ho * wo, kh * kw * c), ho, wo


def maxpool_taps(x, h, w):
    """x: (N, H*W, C) -> 9 stride-2 3x3-window taps (each (N, Ho*Wo, C)), Ho, Wo."""
    n, _, c = x.shape
    x4 = x.reshape(n, h, w, c)
    xp = jnp.pad(x4, ((0, 0), (1, 1), (1, 1), (0, 0)), constant_values=-jnp.inf)
    ho = (h + 2 - 3) // 2 + 1
    wo = (w + 2 - 3) // 2 + 1
    taps = []
    for i in range(3):
        for j in range(3):
            v = lax.slice(xp, (0, i, j, 0),
                          (n, i + 2 * (ho - 1) + 1, j + 2 * (wo - 1) + 1, c),
                          (1, 2, 2, 1))
            taps.append(v.reshape(n, ho * wo, c))
    return taps, ho, wo


# ------------------------------ Pallas kernels -------------------------------

def make_stem_conv_call(n, hw, kdim, c):
    """conv1 (7x7/s2/p3) as an im2col matmul, gridded over batch."""

    def kernel(cols_ref, w_ref, o_ref):
        o_ref[0] = jnp.dot(cols_ref[0], w_ref[...],
                           preferred_element_type=jnp.float32).astype(o_ref.dtype)

    return pl.pallas_call(
        kernel,
        out_shape=jax.ShapeDtypeStruct((n, hw, c), jnp.bfloat16),
        grid=(n,),
        in_specs=[pl.BlockSpec((1, hw, kdim), lambda i: (i, 0, 0)),
                  pl.BlockSpec((kdim, c), lambda i: (0, 0))],
        out_specs=pl.BlockSpec((1, hw, c), lambda i: (i, 0, 0)),
        compiler_params=pltpu.CompilerParams(dimension_semantics=("parallel",)),
    )


def make_maxpool9_call(n, hw, c):
    """MaxPool2d(3, stride=2, pad=1): running max over 9 window taps (9 inputs)."""

    def kernel(*refs):
        o_ref = refs[-1]
        m = refs[0][0]
        for t in range(1, 9):
            m = jnp.maximum(m, refs[t][0])
        o_ref[0] = m

    spec = pl.BlockSpec((1, hw, c), lambda i: (i, 0, 0))
    return pl.pallas_call(
        kernel,
        out_shape=jax.ShapeDtypeStruct((n, hw, c), jnp.bfloat16),
        grid=(n,),
        in_specs=[spec] * 9,
        out_specs=spec,
        compiler_params=pltpu.CompilerParams(dimension_semantics=("parallel",)),
    )


def make_dense_block_call(n, h, w, c_in, nb, g):
    """One dense block (all `nb` Bottlenecks fused into a single kernel).

    Bottleneck i: BN-ReLU-1x1conv(4g) -> BN-ReLU-3x3conv(g).  The 3x3 conv is 9
    accumulating shifted matmuls; each tap's spatial shift + zero-pad mask is an
    exact 0/1 selection matmul, and its weights are pre-placed into the channels
    [c_in+i*g, c_in+(i+1)*g) of the slab, so the DenseNet concat is a plain add.
    """
    hw = h * w
    c_tot = c_in + nb * g

    def kernel(*refs):
        x_ref, o_ref = refs[0], refs[-1]
        feat = x_ref[0].astype(jnp.float32)                       # (hw, c_tot)

        # Tap selection matrices (shift + boundary mask), hoisted out of the
        # bottleneck loop and built once per grid step from iota.
        r = lax.broadcasted_iota(jnp.int32, (hw, hw), 0)          # output row
        q = lax.broadcasted_iota(jnp.int32, (hw, hw), 1)          # source row
        rh, rw = r // w, r % w
        sels = []
        for (oi, oj) in _tap_offsets():
            ok = ((q == r + (oi * w + oj)) &
                  (rh + oi >= 0) & (rh + oi < h) &
                  (rw + oj >= 0) & (rw + oj < w))
            sels.append(jnp.where(ok, 1.0, 0.0).astype(jnp.bfloat16))

        for i in range(nb):
            s1, b1, w1, s2, b2, w2w = refs[1 + 6 * i: 7 + 6 * i]
            # BN1 + ReLU (f32) then 1x1 conv on the MXU (bf16 in, f32 acc)
            pre1 = jnp.maximum(feat * s1[...] + b1[...], 0.0)
            hid = jnp.dot(pre1.astype(jnp.bfloat16), w1[...],
                          preferred_element_type=jnp.float32)     # (hw, 4g)
            # BN2 + ReLU
            pre2 = jnp.maximum(hid * s2[...] + b2[...], 0.0).astype(jnp.bfloat16)
            # 3x3 conv: 9 accumulating shifted matmuls, channel placement baked
            # into the zero columns of w2w -> plain accumulation into the slab.
            for t in range(9):
                shifted = jnp.dot(sels[t], pre2,
                                  preferred_element_type=jnp.float32
                                  ).astype(jnp.bfloat16)          # (hw, 4g)
                feat = feat + jnp.dot(
                    shifted, w2w[t * 4 * g:(t + 1) * 4 * g, :],
                    preferred_element_type=jnp.float32)           # (hw, c_tot)

        o_ref[0] = feat.astype(o_ref.dtype)

    act = pl.BlockSpec((1, hw, c_tot), lambda i: (i, 0, 0))
    par = lambda shape: pl.BlockSpec(shape, lambda i: (0, 0))
    in_specs = [act]
    for _ in range(nb):
        in_specs += [par((1, c_tot)), par((1, c_tot)), par((c_tot, 4 * g)),
                     par((1, 4 * g)), par((1, 4 * g)), par((9 * 4 * g, c_tot))]

    return pl.pallas_call(
        kernel,
        out_shape=jax.ShapeDtypeStruct((n, hw, c_tot), jnp.bfloat16),
        grid=(n,),
        in_specs=in_specs,
        out_specs=act,
        compiler_params=pltpu.CompilerParams(dimension_semantics=("parallel",)),
    )


def make_transition_call(n, h, w, c_in, c_out_pad):
    """Transition: BN-ReLU-1x1conv fused with avg_pool2d(2) (pooling matmul)."""
    hw = h * w
    hwo = (h // 2) * (w // 2)

    def kernel(x_ref, s_ref, b_ref, w_ref, p_ref, o_ref):
        x = x_ref[0].astype(jnp.float32)
        pre = jnp.maximum(x * s_ref[...] + b_ref[...], 0.0)
        conv = jnp.dot(pre.astype(jnp.bfloat16), w_ref[...],
                       preferred_element_type=jnp.float32)        # (hw, c_out_pad)
        pooled = jnp.dot(p_ref[...], conv,
                         preferred_element_type=jnp.float32)      # (hwo, c_out_pad)
        o_ref[0] = pooled.astype(o_ref.dtype)

    return pl.pallas_call(
        kernel,
        out_shape=jax.ShapeDtypeStruct((n, hwo, c_out_pad), jnp.bfloat16),
        grid=(n,),
        in_specs=[pl.BlockSpec((1, hw, c_in), lambda i: (i, 0, 0)),
                  pl.BlockSpec((1, c_in), lambda i: (0, 0)),
                  pl.BlockSpec((1, c_in), lambda i: (0, 0)),
                  pl.BlockSpec((c_in, c_out_pad), lambda i: (0, 0)),
                  pl.BlockSpec((hwo, hw), lambda i: (0, 0))],
        out_specs=pl.BlockSpec((1, hwo, c_out_pad), lambda i: (i, 0, 0)),
        compiler_params=pltpu.CompilerParams(dimension_semantics=("parallel",)),
    )


def make_head_call(n, hw, c, n_cls):
    """Head: BN + ReLU + global avg pool (pooling matmul) + linear + softmax."""

    def kernel(x_ref, s_ref, b_ref, p_ref, w_ref, bias_ref, o_ref):
        x = x_ref[...].astype(jnp.float32)                        # (n*hw, c)
        pre = jnp.maximum(x * s_ref[...] + b_ref[...], 0.0)
        pooled = jnp.dot(p_ref[...], pre,
                         preferred_element_type=jnp.float32)      # (n, c)
        logits = jnp.dot(pooled, w_ref[...],
                         preferred_element_type=jnp.float32) + bias_ref[...]
        m = jnp.max(logits, axis=-1, keepdims=True)
        e = jnp.exp(logits - m)
        o_ref[...] = e / jnp.sum(e, axis=-1, keepdims=True)

    vspec = pl.BlockSpec(memory_space=pltpu.MemorySpace.VMEM)
    return pl.pallas_call(
        kernel,
        out_shape=jax.ShapeDtypeStruct((n, n_cls), jnp.float32),
        in_specs=[vspec] * 6,
        out_specs=vspec,
    )


# ------------------------------ parameter init -------------------------------

def init_densenet(key, num_block=(2, 2, 2, 2), growth=12, reduction=0.5,
                  num_classes=10, fn_size=1, pool_size=2):
    keys = iter(jax.random.split(key, 64))
    params = {"growth": growth, "pool_size": pool_size}

    num_planes = 2 * growth
    slab1 = num_planes + num_block[0] * growth            # dense1 slab width
    w0 = np.asarray(conv_w(next(keys), 7, 7, 3, num_planes)).reshape(7 * 7 * 3,
                                                                     num_planes)
    params["conv1_w"] = jnp.asarray(pad_cols(w0, slab1)).astype(jnp.bfloat16)

    in_planes = num_planes
    for d in range(4):
        nb = num_block[d]
        c_tot = in_planes + nb * growth
        bots = []
        for i in range(nb):
            c = in_planes + i * growth
            s1, b1 = bn_affine(c, c_tot)
            w1 = np.asarray(conv_w(next(keys), 1, 1, c, 4 * growth)
                            ).reshape(c, 4 * growth)
            w1 = jnp.asarray(pad_rows(w1, c_tot)).astype(jnp.bfloat16)
            s2, b2 = bn_affine(4 * growth, 4 * growth)
            w2 = np.asarray(conv_w(next(keys), 3, 3, 4 * growth, growth))
            w2w = np.zeros((9 * 4 * growth, c_tot), np.float32)
            for t in range(9):
                w2w[t * 4 * growth:(t + 1) * 4 * growth, c:c + growth] = \
                    w2[t // 3, t % 3]
            bots.append((s1, b1, w1, s2, b2,
                         jnp.asarray(w2w).astype(jnp.bfloat16)))
        params[f"dense{d + 1}"] = {"c_in": in_planes, "bottlenecks": bots}
        in_planes = c_tot
        if d < 3:
            out_planes = int(math.floor(in_planes * reduction))
            slab_next = out_planes + num_block[d + 1] * growth
            s, b = bn_affine(in_planes, in_planes)
            tw = np.asarray(conv_w(next(keys), 1, 1, in_planes, out_planes)
                            ).reshape(in_planes, out_planes)
            params[f"trans{d + 1}"] = {
                "s": s, "b": b,
                "w": jnp.asarray(pad_cols(tw, slab_next)).astype(jnp.bfloat16)}
            in_planes = out_planes

    params["bn_s"], params["bn_b"] = bn_affine(in_planes, in_planes)
    feat = in_planes * fn_size
    bound = 1.0 / math.sqrt(feat)
    params["lin_w"] = jax.random.uniform(next(keys), (feat, num_classes),
                                         jnp.float32, -bound, bound)
    params["lin_b"] = jnp.zeros((1, num_classes), jnp.float32)
    return params


# --------------------------------- forward -----------------------------------

def densenet_forward(params, x_nchw):
    g = params["growth"]
    n = x_nchw.shape[0]
    x = jnp.transpose(x_nchw, (0, 2, 3, 1)).astype(jnp.bfloat16)  # NCHW -> NHWC

    # ---- stem: conv1 (7x7/s2/p3) + MaxPool2d(3, 2, 1) ----
    cols, hc, wc = im2col(x, 7, 7, 2, 3)
    c_slab = params["conv1_w"].shape[1]
    conv = make_stem_conv_call(n, hc * wc, cols.shape[-1], c_slab)(
        cols, params["conv1_w"])
    taps, hp, wp = maxpool_taps(conv, hc, wc)
    h = make_maxpool9_call(n, hp * wp, c_slab)(*taps)

    # ---- dense blocks + transitions ----
    hh, ww = hp, wp
    for d in range(4):
        blk = params[f"dense{d + 1}"]
        nb = len(blk["bottlenecks"])
        flat = [a for bp in blk["bottlenecks"] for a in bp]
        h = make_dense_block_call(n, hh, ww, blk["c_in"], nb, g)(h, *flat)
        if d < 3:
            tr = params[f"trans{d + 1}"]
            h = make_transition_call(n, hh, ww, h.shape[-1], tr["w"].shape[1])(
                h, tr["s"], tr["b"], tr["w"], avgpool2_matrix(hh, ww))
            hh, ww = hh // 2, ww // 2

    # ---- head: BN + ReLU + avg_pool(pool_size) + flatten + linear + softmax ----
    # TODO(synk): assumes avg_pool2d(pool_size) reduces the remaining map to 1x1
    #             (true for the default 64x64 / pool_size=2 configuration).
    hw = hh * ww
    c = h.shape[-1]
    return make_head_call(n, hw, c, params["lin_w"].shape[1])(
        h.reshape(n * hw, c), params["bn_s"], params["bn_b"],
        global_avg_matrix(n, hw), params["lin_w"], params["lin_b"])


# ----------------------------------- main ------------------------------------

if __name__ == "__main__":
    key = jax.random.PRNGKey(0)
    pkey, xkey = jax.random.split(key)

    # small DenseNet: growth=12, num_block=[2,2,2,2], pool_size=2, fn_size=1
    params = init_densenet(pkey)

    # PyTorch NCHW input: 64x64 -> conv1 32 -> pool 16 -> 8 -> 4 -> 2 -> head 1
    x = jax.random.normal(xkey, (2, 3, 64, 64), jnp.float32)

    out = jax.block_until_ready(densenet_forward(params, x))

    assert out.shape == (2, 10), out.shape
    assert bool(jnp.all(jnp.isfinite(out)))
    assert bool(jnp.allclose(jnp.sum(out, axis=1), 1.0, atol=1e-5))
    print("KERNEL_OK")
</pallas_src>

<mosaic_0001>
module attributes {stable_mosaic.version = 11 : i64} {
  func.func @kernel(%arg0: i32, %arg1: memref<1x1024x147xbf16, #tpu.memory_space<vmem>>, %arg2: memref<147x48xbf16, #tpu.memory_space<vmem>>, %arg3: memref<1x1024x48xbf16, #tpu.memory_space<vmem>>) attributes {dimension_semantics = [#tpu.dimension_semantics<parallel>], iteration_bounds = array<i64: 2>, scalar_prefetch = 0 : i64, scratch_operands = 0 : i64, tpu.core_type = #tpu.core_type<tc>, window_params = [{transform_indices = @transform_0, window_bounds = array<i64: 1, 1024, 147>}, {pipeline_mode = #tpu.pipeline_mode<synchronous>, transform_indices = @transform_1, window_bounds = array<i64: 147, 48>}, {transform_indices = @transform_2, window_bounds = array<i64: 1, 1024, 48>}]} {
    %c0 = arith.constant 0 : index
    %c0_0 = arith.constant 0 : index
    %c0_1 = arith.constant 0 : index
    %0 = vector.load %arg1[%c0, %c0_0, %c0_1] : memref<1x1024x147xbf16, #tpu.memory_space<vmem>>, vector<1x1024x147xbf16>
    %1 = vector.shape_cast %0 : vector<1x1024x147xbf16> to vector<1024x147xbf16>
    %c0_2 = arith.constant 0 : index
    %c0_3 = arith.constant 0 : index
    %2 = vector.load %arg2[%c0_2, %c0_3] : memref<147x48xbf16, #tpu.memory_space<vmem>>, vector<147x48xbf16>
    %cst = arith.constant dense<0.000000e+00> : vector<1024x48xf32>
    %3 = tpu.matmul %1, %2, %cst {dimension_numbers = #tpu.dot_dimension_numbers<[1], [0], [0], [1], [0, 0, 1, 1], [], []>} : vector<1024x147xbf16>, vector<147x48xbf16>, vector<1024x48xf32> -> vector<1024x48xf32>
    %4 = arith.truncf %3 : vector<1024x48xf32> to vector<1024x48xbf16>
    %c0_4 = arith.constant 0 : index
    %c0_5 = arith.constant 0 : index
    %c0_6 = arith.constant 0 : index
    %5 = vector.load %arg3[%c0_4, %c0_5, %c0_6] : memref<1x1024x48xbf16, #tpu.memory_space<vmem>>, vector<1x1024x48xbf16>
    %6 = vector.shape_cast %5 : vector<1x1024x48xbf16> to vector<1024x48xbf16>
    %7 = vector.shape_cast %4 : vector<1024x48xbf16> to vector<1x1024x48xbf16>
    tpu.vector_store %arg3[%c0_4, %c0_5, %c0_6], %7 {strides = array<i32>} : memref<1x1024x48xbf16, #tpu.memory_space<vmem>>, vector<1x1024x48xbf16>,
    return
  }
  func.func @transform_0(%arg0: i32) -> (i32, i32, i32) {
    %c0_i32 = arith.constant 0 : i32
    %c0_i32_0 = arith.constant 0 : i32
    %c0_i32_1 = arith.constant 0 : i32
    return %arg0, %c0_i32, %c0_i32_0 : i32, i32, i32
  }
  func.func @transform_1(%arg0: i32) -> (i32, i32) {
    %c0_i32 = arith.constant 0 : i32
    %c0_i32_0 = arith.constant 0 : i32
    %c0_i32_1 = arith.constant 0 : i32
    return %c0_i32, %c0_i32_0 : i32, i32
  }
  func.func @transform_2(%arg0: i32) -> (i32, i32, i32) {
    %c0_i32 = arith.constant 0 : i32
    %c0_i32_0 = arith.constant 0 : i32
    %c0_i32_1 = arith.constant 0 : i32
    return %arg0, %c0_i32, %c0_i32_0 : i32, i32, i32
  }
}

</mosaic_0001>

<bundles_post_ra>
// kernel: tpu_custom_call.1
= control target key start
LH: loop header
LB: loop body
LE: loop exit
PB: predicated region body
PF: predicated region fallthrough
CT: control target
= control target key end

     0   :  { %s3094_s9 = smov 0   ;;  %s3597_s0 = inlined_call_operand.vmem [shape: bf16[2,1024,147], index: 0, kind: input, shape index: {}]   ;;  %s3598_s1 = inlined_call_operand.vmem [shape: bf16[147,48], index: 1, kind: input, shape index: {}]   ;;  %s3599_s2 = inlined_call_operand.vmem [shape: bf16[2,1024,48], index: 2, kind: output, shape index: {}]  }
   0x1 LB: > { %s2366_s10 = sadd.s32 4294967295, %s3075_s9   ;;  %p2370_p0 = scmp.ge.s32.totalorder %s3075_s9, 1  ;;  %s3075_s9 = sphi %s3094_s9, %s12_s9  }
   0x2   : > { %p112_p1 = scmp.lt.s32.totalorder %s3075_s9, 3 }
   0x4   : > { %p113_p2 = pnand %p2370_p0, %p112_p1 }
   0x5   : > { %v2867_v0 = vld [vmem:[%s3598_s1] sm:$0xff] (!%p113_p2)   ;;  %v3077_v1 = vmov (!%p113_p2), 0   ;;  %v2868_v2 = vld [vmem:[%s3598_s1 + $0x8] sm:$0xff] (!%p113_p2)   ;;  %v2869_v3 = vld [vmem:[%s3598_s1 + $0x10] sm:$0xff] (!%p113_p2)   ;;  %p134_p3 = scmp.lt.s32.totalorder (!%p113_p2), %s2366_s10, 1  ;;  %vm925_vm0 = vcmask (!%p113_p2), 154624  }
   0x6   : > { %116 = sbr.rel (%p113_p2) target bundleno = 511 (0x1ff), region = 28  ;;  %1125 = vmatprep.subr.bf16.mxu0 (!%p113_p2), %v3077_v1  ;;  %2837 = vmatprep.subr.bf16.mxu1 (!%p113_p2), %v3077_v1  ;;  %v2870_v4 = vld [vmem:[%s3598_s1 + $0x18] sm:$0xff] (!%p113_p2)   ;;  %v2871_v6 = vld [vmem:[%s3598_s1 + $0x20] sm:$0xff] (!%p113_p2)   ;;  %v2872_v8 = vld [vmem:[%s3598_s1 + $0x28] sm:$0xff] (!%p113_p2)   ;;  %vm1118_vm1 = vcmask (!%p113_p2), 1040384   ;;  %vm1119_vm2 = vcmask (!%p113_p2), 1041408  }
   0x7   : > { %1126 = vmatpush1.bf16.msra.mxu0 (!%p113_p2), %v2867_v0  ;;  %2847 = vmatpush1.bf16.msra.mxu1 (!%p113_p2), %v2867_v0  ;;  %v2873_v9 = vld [vmem:[%s3598_s1 + $0x30] sm:$0xff] (!%p113_p2)   ;;  %v2874_v10 = vld [vmem:[%s3598_s1 + $0x38] sm:$0xff] (!%p113_p2)   ;;  %v3078_v11 = vmov (!%p113_p2), 65535   ;;  %v2875_v13 = vld [vmem:[%s3598_s1 + $0x40] sm:$0xff] (!%p113_p2)   ;;  %vm2182_vm3 = vcmask (!%p113_p2), 388096  }
   0x8   : > { %1127 = vmatprep.subr.bf16.mxu0 (!%p113_p2), %v3077_v1  ;;  %2838 = vmatprep.subr.bf16.mxu1 (!%p113_p2), %v3077_v1  ;;  %v1120_v12 = vsel (!%p113_p2), %vm1118_vm1, 4294967295, %v3078_v11  ;;  %v2876_v14 = vld [vmem:[%s3598_s1 + $0x48] ss:$0 sps:$4 sm:$0x33] (!%p113_p2)  }
   0x9   : > { %v1121_v15 = vsel (!%p113_p2), %vm1119_vm2, %v1120_v12, 0 }
   0xa   : > { %v1123_v16 = vand.u32 (!%p113_p2), %v2876_v14, %v1121_v15 }
   0xb   : > { %1128 = vmatpush1.bf16.msra.mxu0 (!%p113_p2), %v2868_v2  ;;  %2848 = vmatpush1.bf16.msra.mxu1 (!%p113_p2), %v2868_v2 }
   0xc   : > { %1129 = vmatprep.subr.bf16.mxu0 (!%p113_p2), %v3077_v1  ;;  %2839 = vmatprep.subr.bf16.mxu1 (!%p113_p2), %v3077_v1 }
   0xd   : > { %s3601_s10 = smov (!%p134_p3, %s2366_s10), 1 }
   0xe   : > { %s2707_s19 = sshll.u32 %s3601_s10, 10  ;;  %s2708_s7 = sshll.u32 %s3601_s10, 9 }
   0xf   : > { %1130 = vmatpush1.bf16.msra.mxu0 %v2869_v3  ;;  %2849 = vmatpush1.bf16.msra.mxu1 %v2869_v3  ;;  %s3120_s22 = scalar_lea.vmem %s3597_s0, %s2707_s19  ;;  %s3310_s12 = scalar_lea.vmem %s3599_s2, %s2708_s7 }
  0x10   : > { %1131 = vmatprep.subr.bf16.mxu0 %v3077_v1  ;;  %2840 = vmatprep.subr.bf16.mxu1 %v3077_v1  ;;  %v2879_v5 = vld [vmem:[%s3120_s22 + $0x4] ss:$8 sps:$4 sm:$0xff]   ;;  %v2877_v17 = vld [vmem:[%s3120_s22] ss:$8 sps:$4 sm:$0xff]   ;;  %v2883_v19 = vld [vmem:[%s3120_s22 + $0x14] ss:$8 sps:$4 sm:$0xff]  }
  0x11   : > { %v2882_v7 = vld [vmem:[%s3120_s22 + $0x204] ss:$8 sps:$4 sm:$0xff]   ;;  %2513 = vmatprep.mubr.msk.bf16.mxu0 %vm925_vm0, %v2879_v5  ;;  %v2880_v18 = vld [vmem:[%s3120_s22 + $0x200] ss:$8 sps:$4 sm:$0xff]   ;;  %v2885_v20 = vld [vmem:[%s3120_s22 + $0x214] ss:$8 sps:$4 sm:$0xff]  }
  0x12   : > { %2545 = vmatprep.mubr.msk.bf16.mxu1 %vm925_vm0, %v2882_v7  ;;  %v2887_v21 = vld [vmem:[%s3120_s22 + $0x10] ss:$8 sps:$4 sm:$0xff]   ;;  %v2889_v23 = vld [vmem:[%s3120_s22 + $0x24] ss:$8 sps:$4 sm:$0xff]   ;;  %v2893_v25 = vld [vmem:[%s3120_s22 + $0x20] ss:$8 sps:$4 sm:$0xff]  }
  0x13   : > { %1132 = vmatpush1.bf16.msra.mxu0 %v2870_v4  ;;  %2850 = vmatpush1.bf16.msra.mxu1 %v2870_v4  ;;  %v2888_v22 = vld [vmem:[%s3120_s22 + $0x210] ss:$8 sps:$4 sm:$0xff]   ;;  %v2891_v24 = vld [vmem:[%s3120_s22 + $0x224] ss:$8 sps:$4 sm:$0xff]   ;;  %v2894_v26 = vld [vmem:[%s3120_s22 + $0x220] ss:$8 sps:$4 sm:$0xff]  }
  0x14   : > { %1133 = vmatprep.subr.bf16.mxu0 %v3077_v1  ;;  %2841 = vmatprep.subr.bf16.mxu1 %v3077_v1  ;;  %v2895_v27 = vld [vmem:[%s3120_s22 + $0x34] ss:$8 sps:$4 sm:$0xff]   ;;  %v2899_v29 = vld [vmem:[%s3120_s22 + $0x30] ss:$8 sps:$4 sm:$0xff]   ;;  %v2901_v31 = vld [vmem:[%s3120_s22 + $0x44] ss:$8 sps:$4 sm:$0xff]  }
  0x15   : > { %v2897_v28 = vld [vmem:[%s3120_s22 + $0x234] ss:$8 sps:$4 sm:$0xff]   ;;  %v2900_v30 = vld [vmem:[%s3120_s22 + $0x230] ss:$8 sps:$4 sm:$0xff]   ;;  %v2903_v32 = vld [vmem:[%s3120_s22 + $0x244] ss:$8 sps:$4 sm:$0xff]  }
  0x16   : > { %v2905_v33 = vld [vmem:[%s3120_s22 + $0x40] ss:$8 sps:$4 sm:$0xff]   ;;  %v2907_v35 = vld [vmem:[%s3120_s22 + $0x54] ss:$8 sps:$4 sm:$0xff]   ;;  %v2911_v37 = vld [vmem:[%s3120_s22 + $0x50] ss:$8 sps:$4 sm:$0xff]  }
  0x17   : > { %1134 = vmatpush1.bf16.msra.mxu0 %v2871_v6  ;;  %2851 = vmatpush1.bf16.msra.mxu1 %v2871_v6  ;;  %v2906_v34 = vld [vmem:[%s3120_s22 + $0x240] ss:$8 sps:$4 sm:$0xff]   ;;  %v2909_v36 = vld [vmem:[%s3120_s22 + $0x254] ss:$8 sps:$4 sm:$0xff]   ;;  %v2912_v38 = vld [vmem:[%s3120_s22 + $0x250] ss:$8 sps:$4 sm:$0xff]  }
  0x18   : > { %1135 = vmatprep.subr.bf16.mxu0 %v3077_v1  ;;  %2842 = vmatprep.subr.bf16.mxu1 %v3077_v1  ;;  %v2913_v39 = vld [vmem:[%s3120_s22 + $0x64] ss:$8 sps:$4 sm:$0xff]   ;;  %v2917_v41 = vld [vmem:[%s3120_s22 + $0x60] ss:$8 sps:$4 sm:$0xff]   ;;  %v2919_v43 = vld [vmem:[%s3120_s22 + $0x74] ss:$8 sps:$4 sm:$0xff]  }
  0x19   : > { %v2915_v40 = vld [vmem:[%s3120_s22 + $0x264] ss:$8 sps:$4 sm:$0xff]   ;;  %v2918_v42 = vld [vmem:[%s3120_s22 + $0x260] ss:$8 sps:$4 sm:$0xff]   ;;  %v2921_v44 = vld [vmem:[%s3120_s22 + $0x274] ss:$8 sps:$4 sm:$0xff]  }
  0x1a   : > { %v2923_v45 = vld [vmem:[%s3120_s22 + $0x70] ss:$8 sps:$4 sm:$0xff]   ;;  %v2925_v47 = vld [vmem:[%s3120_s22 + $0x84] ss:$8 sps:$4 sm:$0xff]   ;;  %v2929_v49 = vld [vmem:[%s3120_s22 + $0x80] ss:$8 sps:$4 sm:$0xff]  }
  0x1b   : > { %1136 = vmatpush1.bf16.msra.mxu0 %v2872_v8  ;;  %2852 = vmatpush1.bf16.msra.mxu1 %v2872_v8  ;;  %v2924_v46 = vld [vmem:[%s3120_s22 + $0x270] ss:$8 sps:$4 sm:$0xff]   ;;  %v2927_v48 = vld [vmem:[%s3120_s22 + $0x284] ss:$8 sps:$4 sm:$0xff]   ;;  %v2930_v50 = vld [vmem:[%s3120_s22 + $0x280] ss:$8 sps:$4 sm:$0xff]  }
  0x1c   : > { %1137 = vmatprep.subr.bf16.mxu0 %v3077_v1  ;;  %2843 = vmatprep.subr.bf16.mxu1 %v3077_v1  ;;  %v2931_v51 = vld [vmem:[%s3120_s22 + $0x94] ss:$8 sps:$4 sm:$0xff]   ;;  %v2935_v53 = vld [vmem:[%s3120_s22 + $0x90] ss:$8 sps:$4 sm:$0xff]   ;;  %v2937_v55 = vld [vmem:[%s3120_s22 + $0xa4] ss:$8 sps:$4 sm:$0xff]  }
  0x1d   : > { %v2933_v52 = vld [vmem:[%s3120_s22 + $0x294] ss:$8 sps:$4 sm:$0xff]   ;;  %v2936_v54 = vld [vmem:[%s3120_s22 + $0x290] ss:$8 sps:$4 sm:$0xff]   ;;  %v2939_v56 = vld [vmem:[%s3120_s22 + $0x2a4] ss:$8 sps:$4 sm:$0xff]  }
  0x1e   : > { %v2941_v57 = vld [vmem:[%s3120_s22 + $0xa0] ss:$8 sps:$4 sm:$0xff]   ;;  %v2943_v59 = vld [vmem:[%s3120_s22 + $0xb4] ss:$8 sps:$4 sm:$0xff]   ;;  %v2947_v61 = vld [vmem:[%s3120_s22 + $0xb0] ss:$8 sps:$4 sm:$0xff]  }
  0x1f   : > { %1138 = vmatpush1.bf16.msra.mxu0 %v2873_v9  ;;  %2853 = vmatpush1.bf16.msra.mxu1 %v2873_v9  ;;  %v2942_v58 = vld [vmem:[%s3120_s22 + $0x2a0] ss:$8 sps:$4 sm:$0xff]   ;;  %v2945_v60 = vld [vmem:[%s3120_s22 + $0x2b4] ss:$8 sps:$4 sm:$0xff]   ;;  %v2948_v62 = vld [vmem:[%s3120_s22 + $0x2b0] ss:$8 sps:$4 sm:$0xff]  }
  0x20   : > { %1139 = vmatprep.subr.bf16.mxu0 %v3077_v1  ;;  %2844 = vmatprep.subr.bf16.mxu1 %v3077_v1  ;;  %v2949_v63 = vld [vmem:[%s3120_s22 + $0xc4] ss:$8 sps:$4 sm:$0xff]   ;;  %v2954_v2 = vld [vmem:[%s3120_s22 + $0x2c0] ss:$8 sps:$4 sm:$0xff]   ;;  %v2955_v3 = vld [vmem:[%s3120_s22 + $0xd4] ss:$8 sps:$4 sm:$0xff]  }
  0x21   : > { %v2951_v0 = vld [vmem:[%s3120_s22 + $0x2c4] ss:$8 sps:$4 sm:$0xff]   ;;  %v2957_v4 = vld [vmem:[%s3120_s22 + $0x2d4] ss:$8 sps:$4 sm:$0xff]   ;;  %v2959_v5 = vld [vmem:[%s3120_s22 + $0xd0] ss:$8 sps:$4 sm:$0xff]  }
  0x22   : > { %v2960_v6 = vld [vmem:[%s3120_s22 + $0x2d0] ss:$8 sps:$4 sm:$0xff]   ;;  %v2961_v7 = vld [vmem:[%s3120_s22 + $0xe4] ss:$8 sps:$4 sm:$0xff]   ;;  %v2965_v9 = vld [vmem:[%s3120_s22 + $0xe0] ss:$8 sps:$4 sm:$0xff]  }
  0x23   : > { %1140 = vmatpush1.bf16.msra.mxu0 %v2874_v10  ;;  %2854 = vmatpush1.bf16.msra.mxu1 %v2874_v10  ;;  %v2963_v8 = vld [vmem:[%s3120_s22 + $0x2e4] ss:$8 sps:$4 sm:$0xff]   ;;  %v2966_v10 = vld [vmem:[%s3120_s22 + $0x2e0] ss:$8 sps:$4 sm:$0xff]   ;;  %v2967_v11 = vld [vmem:[%s3120_s22 + $0xf4] ss:$8 sps:$4 sm:$0xff]  }
  0x24   : > { %1141 = vmatprep.subr.bf16.mxu0 %v3077_v1  ;;  %2845 = vmatprep.subr.bf16.mxu1 %v3077_v1  ;;  %v2969_v12 = vld [vmem:[%s3120_s22 + $0x2f4] ss:$8 sps:$4 sm:$0xff]   ;;  %v2972_v14 = vld [vmem:[%s3120_s22 + $0x2f0] ss:$8 sps:$4 sm:$0xff]   ;;  %v2973_v15 = vld [vmem:[%s3120_s22 + $0x104] ss:$8 sps:$4 sm:$0xff]  }
  0x27   : > { %1142 = vmatpush1.bf16.msra.mxu0 %v2875_v13  ;;  %2855 = vmatpush1.bf16.msra.mxu1 %v2875_v13  ;;  %v2971_v13 = vld [vmem:[%s3120_s22 + $0xf0] ss:$8 sps:$4 sm:$0xff]  }
  0x28   : > { %1143 = vmatprep.subr.bf16.mxu0 %v3077_v1  ;;  %2846 = vmatprep.subr.bf16.mxu1 %v3077_v1  ;;  %v2953_v1 = vld [vmem:[%s3120_s22 + $0xc0] ss:$8 sps:$4 sm:$0xff]  }
  0x2b   : > { %1144 = vmatpush1.bf16.msra.mxu0 %v1123_v16  ;;  %2856 = vmatpush1.bf16.msra.mxu1 %v1123_v16  ;;  %v2975_v16 = vld [vmem:[%s3120_s22 + $0x304] ss:$8 sps:$4 sm:$0xff]  }
  0x2e   : > { %1158 = vmatmul.mubr.bf16.vlgmr.msra.gmra.mrb[0].mxu0 %v2877_v17  ;;  %1414 = vmatmul.mubr.bf16.vlgmr.msra.gmra.mrb[0].mxu1 %v2880_v18  ;;  %v2977_v17 = vld [vmem:[%s3120_s22 + $0x100] ss:$8 sps:$4 sm:$0xff]  }
  0x2f   : > { %2514 = vmatprep.mubr.msk.bf16.mxu0 %vm925_vm0, %v2883_v19  ;;  %2546 = vmatprep.mubr.msk.bf16.mxu1 %vm925_vm0, %v2885_v20  ;;  %v2978_v18 = vld [vmem:[%s3120_s22 + $0x300] ss:$8 sps:$4 sm:$0xff]   ;;  %v2979_v19 = vld [vmem:[%s3120_s22 + $0x114] ss:$8 sps:$4 sm:$0xff]  }
  0x30   : > { %v2981_v20 = vld [vmem:[%s3120_s22 + $0x314] ss:$8 sps:$4 sm:$0xff]  }
  0x36   : > { %1166 = vmatmul.mubr.bf16.gmra.mrb[4].mxu0 %v2887_v21  ;;  %1422 = vmatmul.mubr.bf16.gmra.mrb[4].mxu1 %v2888_v22  ;;  %v2983_v21 = vld [vmem:[%s3120_s22 + $0x110] ss:$8 sps:$4 sm:$0xff]  }
  0x37   : > { %2515 = vmatprep.mubr.msk.bf16.mxu0 %vm925_vm0, %v2889_v23  ;;  %2547 = vmatprep.mubr.msk.bf16.mxu1 %vm925_vm0, %v2891_v24  ;;  %v2984_v22 = vld [vmem:[%s3120_s22 + $0x310] ss:$8 sps:$4 sm:$0xff]   ;;  %v2985_v23 = vld [vmem:[%s3120_s22 + $0x124] ss:$8 sps:$4 sm:$0xff]  }
  0x38   : > { %v2987_v24 = vld [vmem:[%s3120_s22 + $0x324] ss:$8 sps:$4 sm:$0xff]  }
  0x3e   : > { %1174 = vmatmul.mubr.bf16.gmra.mrb[8].mxu0 %v2893_v25  ;;  %1430 = vmatmul.mubr.bf16.gmra.mrb[8].mxu1 %v2894_v26  ;;  %v2989_v25 = vld [vmem:[%s3120_s22 + $0x120] ss:$8 sps:$4 sm:$0xff]  }
  0x3f   : > { %2516 = vmatprep.mubr.msk.bf16.mxu0 %vm925_vm0, %v2895_v27  ;;  %2548 = vmatprep.mubr.msk.bf16.mxu1 %vm925_vm0, %v2897_v28  ;;  %v2990_v26 = vld [vmem:[%s3120_s22 + $0x320] ss:$8 sps:$4 sm:$0xff]   ;;  %v2991_v27 = vld [vmem:[%s3120_s22 + $0x134] ss:$8 sps:$4 sm:$0xff]  }
  0x40   : > { %v2993_v28 = vld [vmem:[%s3120_s22 + $0x334] ss:$8 sps:$4 sm:$0xff]  }
  0x46   : > { %1182 = vmatmul.mubr.bf16.gmra.mrb[12].mxu0 %v2899_v29  ;;  %1438 = vmatmul.mubr.bf16.gmra.mrb[12].mxu1 %v2900_v30  ;;  %v2995_v29 = vld [vmem:[%s3120_s22 + $0x130] ss:$8 sps:$4 sm:$0xff]  }
  0x47   : > { %2517 = vmatprep.mubr.msk.bf16.mxu0 %vm925_vm0, %v2901_v31  ;;  %2549 = vmatprep.mubr.msk.bf16.mxu1 %vm925_vm0, %v2903_v32  ;;  %v2996_v30 = vld [vmem:[%s3120_s22 + $0x330] ss:$8 sps:$4 sm:$0xff]   ;;  %v2997_v31 = vld [vmem:[%s3120_s22 + $0x144] ss:$8 sps:$4 sm:$0xff]  }
  0x48   : > { %v2999_v32 = vld [vmem:[%s3120_s22 + $0x344] ss:$8 sps:$4 sm:$0xff]  }
  0x4e   : > { %1190 = vmatmul.mubr.bf16.gmra.mrb[16].mxu0 %v2905_v33  ;;  %1446 = vmatmul.mubr.bf16.gmra.mrb[16].mxu1 %v2906_v34  ;;  %v3001_v33 = vld [vmem:[%s3120_s22 + $0x140] ss:$8 sps:$4 sm:$0xff]  }
  0x4f   : > { %2518 = vmatprep.mubr.msk.bf16.mxu0 %vm925_vm0, %v2907_v35  ;;  %2550 = vmatprep.mubr.msk.bf16.mxu1 %vm925_vm0, %v2909_v36  ;;  %v3002_v34 = vld [vmem:[%s3120_s22 + $0x340] ss:$8 sps:$4 sm:$0xff]   ;;  %v3003_v35 = vld [vmem:[%s3120_s22 + $0x154] ss:$8 sps:$4 sm:$0xff]  }
  0x50   : > { %v3005_v36 = vld [vmem:[%s3120_s22 + $0x354] ss:$8 sps:$4 sm:$0xff]  }
  0x56   : > { %1198 = vmatmul.mubr.bf16.gmra.mrb[20].mxu0 %v2911_v37  ;;  %1454 = vmatmul.mubr.bf16.gmra.mrb[20].mxu1 %v2912_v38  ;;  %v3007_v37 = vld [vmem:[%s3120_s22 + $0x150] ss:$8 sps:$4 sm:$0xff]  }
  0x57   : > { %2519 = vmatprep.mubr.msk.bf16.mxu0 %vm925_vm0, %v2913_v39  ;;  %2551 = vmatprep.mubr.msk.bf16.mxu1 %vm925_vm0, %v2915_v40  ;;  %v3008_v38 = vld [vmem:[%s3120_s22 + $0x350] ss:$8 sps:$4 sm:$0xff]   ;;  %v3009_v39 = vld [vmem:[%s3120_s22 + $0x164] ss:$8 sps:$4 sm:$0xff]  }
  0x58   : > { %v3011_v40 = vld [vmem:[%s3120_s22 + $0x364] ss:$8 sps:$4 sm:$0xff]  }
  0x5e   : > { %1206 = vmatmul.mubr.bf16.gmra.mrb[24].mxu0 %v2917_v41  ;;  %1462 = vmatmul.mubr.bf16.gmra.mrb[24].mxu1 %v2918_v42  ;;  %v3013_v41 = vld [vmem:[%s3120_s22 + $0x160] ss:$8 sps:$4 sm:$0xff]  }
  0x5f   : > { %2520 = vmatprep.mubr.msk.bf16.mxu0 %vm925_vm0, %v2919_v43  ;;  %2552 = vmatprep.mubr.msk.bf16.mxu1 %vm925_vm0, %v2921_v44  ;;  %v3014_v42 = vld [vmem:[%s3120_s22 + $0x360] ss:$8 sps:$4 sm:$0xff]   ;;  %v3015_v43 = vld [vmem:[%s3120_s22 + $0x174] ss:$8 sps:$4 sm:$0xff]  }
  0x60   : > { %v3017_v44 = vld [vmem:[%s3120_s22 + $0x374] ss:$8 sps:$4 sm:$0xff]  }
  0x66   : > { %1214 = vmatmul.mubr.bf16.gmra.mrb[28].mxu0 %v2923_v45  ;;  %1470 = vmatmul.mubr.bf16.gmra.mrb[28].mxu1 %v2924_v46  ;;  %v3019_v45 = vld [vmem:[%s3120_s22 + $0x170] ss:$8 sps:$4 sm:$0xff]  }
  0x67   : > { %2521 = vmatprep.mubr.msk.bf16.mxu0 %vm925_vm0, %v2925_v47  ;;  %2553 = vmatprep.mubr.msk.bf16.mxu1 %vm925_vm0, %v2927_v48  ;;  %v3020_v46 = vld [vmem:[%s3120_s22 + $0x370] ss:$8 sps:$4 sm:$0xff]   ;;  %v3021_v47 = vld [vmem:[%s3120_s22 + $0x184] ss:$8 sps:$4 sm:$0xff]  }
  0x68   : > { %v3023_v48 = vld [vmem:[%s3120_s22 + $0x384] ss:$8 sps:$4 sm:$0xff]  }
  0x6e   : > { %1222 = vmatmul.mubr.bf16.gmra.mrb[32].mxu0 %v2929_v49  ;;  %1478 = vmatmul.mubr.bf16.gmra.mrb[32].mxu1 %v2930_v50  ;;  %v3025_v49 = vld [vmem:[%s3120_s22 + $0x180] ss:$8 sps:$4 sm:$0xff]  }
  0x6f   : > { %2522 = vmatprep.mubr.msk.bf16.mxu0 %vm925_vm0, %v2931_v51  ;;  %2554 = vmatprep.mubr.msk.bf16.mxu1 %vm925_vm0, %v2933_v52  ;;  %v3026_v50 = vld [vmem:[%s3120_s22 + $0x380] ss:$8 sps:$4 sm:$0xff]   ;;  %v3027_v51 = vld [vmem:[%s3120_s22 + $0x194] ss:$8 sps:$4 sm:$0xff]  }
  0x70   : > { %v3029_v52 = vld [vmem:[%s3120_s22 + $0x394] ss:$8 sps:$4 sm:$0xff]  }
  0x76   : > { %1230 = vmatmul.mubr.bf16.gmra.mrb[36].mxu0 %v2935_v53  ;;  %1486 = vmatmul.mubr.bf16.gmra.mrb[36].mxu1 %v2936_v54  ;;  %v3031_v53 = vld [vmem:[%s3120_s22 + $0x190] ss:$8 sps:$4 sm:$0xff]  }
  0x77   : > { %2523 = vmatprep.mubr.msk.bf16.mxu0 %vm925_vm0, %v2937_v55  ;;  %2555 = vmatprep.mubr.msk.bf16.mxu1 %vm925_vm0, %v2939_v56  ;;  %v3032_v54 = vld [vmem:[%s3120_s22 + $0x390] ss:$8 sps:$4 sm:$0xff]   ;;  %v3033_v55 = vld [vmem:[%s3120_s22 + $0x1a4] ss:$8 sps:$4 sm:$0xff]  }
  0x78   : > { %v3035_v56 = vld [vmem:[%s3120_s22 + $0x3a4] ss:$8 sps:$4 sm:$0xff]  }
  0x7e   : > { %1238 = vmatmul.mubr.bf16.gmra.mrb[40].mxu0 %v2941_v57  ;;  %1494 = vmatmul.mubr.bf16.gmra.mrb[40].mxu1 %v2942_v58  ;;  %v3037_v57 = vld [vmem:[%s3120_s22 + $0x1a0] ss:$8 sps:$4 sm:$0xff]  }
  0x7f   : > { %2524 = vmatprep.mubr.msk.bf16.mxu0 %vm925_vm0, %v2943_v59  ;;  %2556 = vmatprep.mubr.msk.bf16.mxu1 %vm925_vm0, %v2945_v60  ;;  %v3038_v58 = vld [vmem:[%s3120_s22 + $0x3a0] ss:$8 sps:$4 sm:$0xff]   ;;  %v3039_v59 = vld [vmem:[%s3120_s22 + $0x1b4] ss:$8 sps:$4 sm:$0xff]  }
  0x80   : > { %v3041_v60 = vld [vmem:[%s3120_s22 + $0x3b4] ss:$8 sps:$4 sm:$0xff]  }
  0x86   : > { %1246 = vmatmul.mubr.bf16.gmra.mrb[44].mxu0 %v2947_v61  ;;  %1502 = vmatmul.mubr.bf16.gmra.mrb[44].mxu1 %v2948_v62 }
  0x87   : > { %2525 = vmatprep.mubr.msk.bf16.mxu0 %vm925_vm0, %v2949_v63  ;;  %2557 = vmatprep.mubr.msk.bf16.mxu1 %vm925_vm0, %v2951_v0 }
  0x8e   : > { %1254 = vmatmul.mubr.bf16.gmra.mrb[48].mxu0 %v2953_v1  ;;  %1510 = vmatmul.mubr.bf16.gmra.mrb[48].mxu1 %v2954_v2 }
  0x8f   : > { %2526 = vmatprep.mubr.msk.bf16.mxu0 %vm925_vm0, %v2955_v3  ;;  %2558 = vmatprep.mubr.msk.bf16.mxu1 %vm925_vm0, %v2957_v4  ;;  %v3043_v3 = vld [vmem:[%s3120_s22 + $0x1b0] ss:$8 sps:$4 sm:$0xff]  }
  0x90   : > { %v3044_v4 = vld [vmem:[%s3120_s22 + $0x3b0] ss:$8 sps:$4 sm:$0xff]  }
  0x96   : > { %1262 = vmatmul.mubr.bf16.gmra.mrb[52].mxu0 %v2959_v5  ;;  %1518 = vmatmul.mubr.bf16.gmra.mrb[52].mxu1 %v2960_v6 }
  0x97   : > { %2527 = vmatprep.mubr.msk.bf16.mxu0 %vm925_vm0, %v2961_v7  ;;  %2559 = vmatprep.mubr.msk.bf16.mxu1 %vm925_vm0, %v2963_v8  ;;  %v3045_v7 = vld [vmem:[%s3120_s22 + $0x1c4] ss:$8 sps:$4 sm:$0xff]  }
  0x98   : > { %v3047_v8 = vld [vmem:[%s3120_s22 + $0x3c4] ss:$8 sps:$4 sm:$0xff]  }
  0x9e   : > { %1270 = vmatmul.mubr.bf16.gmra.mrb[56].mxu0 %v2965_v9  ;;  %1526 = vmatmul.mubr.bf16.gmra.mrb[56].mxu1 %v2966_v10 }
  0x9f   : > { %2528 = vmatprep.mubr.msk.bf16.mxu0 %vm925_vm0, %v2967_v11  ;;  %2560 = vmatprep.mubr.msk.bf16.mxu1 %vm925_vm0, %v2969_v12 }
  0xa6   : > { %1278 = vmatmul.mubr.bf16.gmra.mrb[60].mxu0 %v2971_v13  ;;  %1534 = vmatmul.mubr.bf16.gmra.mrb[60].mxu1 %v2972_v14 }
  0xa7   : > { %2529 = vmatprep.mubr.msk.bf16.mxu0 %vm925_vm0, %v2973_v15  ;;  %2561 = vmatprep.mubr.msk.bf16.mxu1 %vm925_vm0, %v2975_v16 }
  0xae   : > { %1286 = vmatmul.mubr.bf16.gmra.mrb[64].mxu0 %v2977_v17  ;;  %1542 = vmatmul.mubr.bf16.gmra.mrb[64].mxu1 %v2978_v18 }
  0xaf   : > { %2530 = vmatprep.mubr.msk.bf16.mxu0 %vm925_vm0, %v2979_v19  ;;  %2562 = vmatprep.mubr.msk.bf16.mxu1 %vm925_vm0, %v2981_v20  ;;  %v3049_v19 = vld [vmem:[%s3120_s22 + $0x1c0] ss:$8 sps:$4 sm:$0xff]  }
  0xb0   : > { %v3050_v20 = vld [vmem:[%s3120_s22 + $0x3c0] ss:$8 sps:$4 sm:$0xff]  }
  0xb6   : > { %1294 = vmatmul.mubr.bf16.gmra.mrb[68].mxu0 %v2983_v21  ;;  %1550 = vmatmul.mubr.bf16.gmra.mrb[68].mxu1 %v2984_v22 }
  0xb7   : > { %2531 = vmatprep.mubr.msk.bf16.mxu0 %vm925_vm0, %v2985_v23  ;;  %2563 = vmatprep.mubr.msk.bf16.mxu1 %vm925_vm0, %v2987_v24  ;;  %v3051_v23 = vld [vmem:[%s3120_s22 + $0x1d4] ss:$8 sps:$4 sm:$0xff]  }
  0xb8   : > { %v3053_v24 = vld [vmem:[%s3120_s22 + $0x3d4] ss:$8 sps:$4 sm:$0xff]  }
  0xbe   : > { %1302 = vmatmul.mubr.bf16.gmra.mrb[72].mxu0 %v2989_v25  ;;  %1558 = vmatmul.mubr.bf16.gmra.mrb[72].mxu1 %v2990_v26 }
  0xbf   : > { %2532 = vmatprep.mubr.msk.bf16.mxu0 %vm925_vm0, %v2991_v27  ;;  %2564 = vmatprep.mubr.msk.bf16.mxu1 %vm925_vm0, %v2993_v28 }
  0xc6   : > { %1310 = vmatmul.mubr.bf16.gmra.mrb[76].mxu0 %v2995_v29  ;;  %1566 = vmatmul.mubr.bf16.gmra.mrb[76].mxu1 %v2996_v30 }
  0xc7   : > { %2533 = vmatprep.mubr.msk.bf16.mxu0 %vm925_vm0, %v2997_v31  ;;  %2565 = vmatprep.mubr.msk.bf16.mxu1 %vm925_vm0, %v2999_v32 }
  0xce   : > { %1318 = vmatmul.mubr.bf16.gmra.mrb[80].mxu0 %v3001_v33  ;;  %1574 = vmatmul.mubr.bf16.gmra.mrb[80].mxu1 %v3002_v34 }
  0xcf   : > { %2534 = vmatprep.mubr.msk.bf16.mxu0 %vm925_vm0, %v3003_v35  ;;  %2566 = vmatprep.mubr.msk.bf16.mxu1 %vm925_vm0, %v3005_v36  ;;  %v3055_v35 = vld [vmem:[%s3120_s22 + $0x1d0] ss:$8 sps:$4 sm:$0xff]  }
  0xd0   : > { %v3056_v36 = vld [vmem:[%s3120_s22 + $0x3d0] ss:$8 sps:$4 sm:$0xff]  }
  0xd6   : > { %1326 = vmatmul.mubr.bf16.gmra.mrb[84].mxu0 %v3007_v37  ;;  %1582 = vmatmul.mubr.bf16.gmra.mrb[84].mxu1 %v3008_v38 }
  0xd7   : > { %2535 = vmatprep.mubr.msk.bf16.mxu0 %vm925_vm0, %v3009_v39  ;;  %2567 = vmatprep.mubr.msk.bf16.mxu1 %vm925_vm0, %v3011_v40  ;;  %v3057_v39 = vld [vmem:[%s3120_s22 + $0x1e4] ss:$8 sps:$4 sm:$0xff]  }
  0xd8   : > { %v3059_v40 = vld [vmem:[%s3120_s22 + $0x3e4] ss:$8 sps:$4 sm:$0xff]  }
  0xde   : > { %1334 = vmatmul.mubr.bf16.gmra.mrb[88].mxu0 %v3013_v41  ;;  %1590 = vmatmul.mubr.bf16.gmra.mrb[88].mxu1 %v3014_v42 }
  0xdf   : > { %2536 = vmatprep.mubr.msk.bf16.mxu0 %vm925_vm0, %v3015_v43  ;;  %2568 = vmatprep.mubr.msk.bf16.mxu1 %vm925_vm0, %v3017_v44 }
  0xe6   : > { %1342 = vmatmul.mubr.bf16.gmra.mrb[92].mxu0 %v3019_v45  ;;  %1598 = vmatmul.mubr.bf16.gmra.mrb[92].mxu1 %v3020_v46 }
  0xe7   : > { %2537 = vmatprep.mubr.msk.bf16.mxu0 %vm925_vm0, %v3021_v47  ;;  %2569 = vmatprep.mubr.msk.bf16.mxu1 %vm925_vm0, %v3023_v48 }
  0xee   : > { %1350 = vmatmul.mubr.bf16.gmra.mrb[96].mxu0 %v3025_v49  ;;  %1606 = vmatmul.mubr.bf16.gmra.mrb[96].mxu1 %v3026_v50 }
  0xef   : > { %2538 = vmatprep.mubr.msk.bf16.mxu0 %vm925_vm0, %v3027_v51  ;;  %2570 = vmatprep.mubr.msk.bf16.mxu1 %vm925_vm0, %v3029_v52  ;;  %v3061_v51 = vld [vmem:[%s3120_s22 + $0x1e0] ss:$8 sps:$4 sm:$0xff]  }
  0xf0   : > { %v3062_v52 = vld [vmem:[%s3120_s22 + $0x3e0] ss:$8 sps:$4 sm:$0xff]  }
  0xf6   : > { %1358 = vmatmul.mubr.bf16.gmra.mrb[100].mxu0 %v3031_v53  ;;  %1614 = vmatmul.mubr.bf16.gmra.mrb[100].mxu1 %v3032_v54 }
  0xf7   : > { %2539 = vmatprep.mubr.msk.bf16.mxu0 %vm925_vm0, %v3033_v55  ;;  %2571 = vmatprep.mubr.msk.bf16.mxu1 %vm925_vm0, %v3035_v56  ;;  %v3063_v55 = vld [vmem:[%s3120_s22 + $0x1f4] ss:$8 sps:$4 sm:$0xff]  }
  0xf8   : > { %v3065_v56 = vld [vmem:[%s3120_s22 + $0x3f4] ss:$8 sps:$4 sm:$0xff]  }
  0xfe   : > { %1366 = vmatmul.mubr.bf16.gmra.mrb[104].mxu0 %v3037_v57  ;;  %1622 = vmatmul.mubr.bf16.gmra.mrb[104].mxu1 %v3038_v58 }
  0xff   : > { %2540 = vmatprep.mubr.msk.bf16.mxu0 %vm925_vm0, %v3039_v59  ;;  %2572 = vmatprep.mubr.msk.bf16.mxu1 %vm925_vm0, %v3041_v60 }
 0x101   : > { %v1159_v61 = vpop.f32.mrb[0].mxu0  ;;  %v1415_v62 = vpop.f32.mrb[0].mxu1 }
 0x102   : > { %v2709_v63 = vpack.c.bf16 %v1159_v61, %v1159_v61  ;;  %v2773_v0 = vpack.c.bf16 %v1415_v62, %v1415_v62  ;;  %v1161_v1 = vpop.f32.mrb[1].mxu0  ;;  %v1417_v2 = vpop.f32.mrb[1].mxu1 }
 0x103   : > { %v1162_v5 = vpop.f32.mrb[2].mxu0  ;;  %v1418_v6 = vpop.f32.mrb[2].mxu1 }
 0x104   : > { %2183 = vst.msk [vmem:[%s3310_s12] sm:$0xf] %vm2182_vm3, %v2709_v63  ;;  %2247 = vst.msk [vmem:[%s3310_s12 + $0x100] sm:$0xf] %vm2182_vm3, %v2773_v0  ;;  %v2710_v9 = vpack.c.bf16 %v1162_v5, %v1162_v5  ;;  %v2774_v10 = vpack.c.bf16 %v1418_v6, %v1418_v6  ;;  %v1164_v11 = vpop.f32.mrb[3].mxu0  ;;  %v1420_v12 = vpop.f32.mrb[3].mxu1 }
 0x106   : > { %2184 = vst.msk [vmem:[%s3310_s12 + $0x4] sm:$0xf] %vm2182_vm3, %v2710_v9  ;;  %2248 = vst.msk [vmem:[%s3310_s12 + $0x104] sm:$0xf] %vm2182_vm3, %v2774_v10  ;;  %1374 = vmatmul.mubr.bf16.gmra.mrb[108].mxu0 %v3043_v3  ;;  %1630 = vmatmul.mubr.bf16.gmra.mrb[108].mxu1 %v3044_v4  ;;  %v3067_v3 = vld [vmem:[%s3120_s22 + $0x1f0] ss:$8 sps:$4 sm:$0xff]  }
 0x107   : > { %2541 = vmatprep.mubr.msk.bf16.mxu0 %vm925_vm0, %v3045_v7  ;;  %2573 = vmatprep.mubr.msk.bf16.mxu1 %vm925_vm0, %v3047_v8  ;;  %v3068_v4 = vld [vmem:[%s3120_s22 + $0x3f0] ss:$8 sps:$4 sm:$0xff]  }
 0x109   : > { %v1167_v13 = vpop.f32.mrb[4].mxu0  ;;  %v1423_v14 = vpop.f32.mrb[4].mxu1 }
 0x10a   : > { %v2711_v15 = vpack.c.bf16 %v1167_v13, %v1167_v13  ;;  %v2775_v16 = vpack.c.bf16 %v1423_v14, %v1423_v14  ;;  %v1169_v17 = vpop.f32.mrb[5].mxu0  ;;  %v1425_v18 = vpop.f32.mrb[5].mxu1 }
 0x10b   : > { %v1170_v21 = vpop.f32.mrb[6].mxu0  ;;  %v1426_v22 = vpop.f32.mrb[6].mxu1 }
 0x10c   : > { %2185 = vst.msk [vmem:[%s3310_s12 + $0x8] sm:$0xf] %vm2182_vm3, %v2711_v15  ;;  %2249 = vst.msk [vmem:[%s3310_s12 + $0x108] sm:$0xf] %vm2182_vm3, %v2775_v16  ;;  %v2712_v25 = vpack.c.bf16 %v1170_v21, %v1170_v21  ;;  %v2776_v26 = vpack.c.bf16 %v1426_v22, %v1426_v22  ;;  %v1172_v27 = vpop.f32.mrb[7].mxu0  ;;  %v1428_v28 = vpop.f32.mrb[7].mxu1 }
 0x10e   : > { %2186 = vst.msk [vmem:[%s3310_s12 + $0xc] sm:$0xf] %vm2182_vm3, %v2712_v25  ;;  %2250 = vst.msk [vmem:[%s3310_s12 + $0x10c] sm:$0xf] %vm2182_vm3, %v2776_v26  ;;  %1382 = vmatmul.mubr.bf16.gmra.mrb[112].mxu0 %v3049_v19  ;;  %1638 = vmatmul.mubr.bf16.gmra.mrb[112].mxu1 %v3050_v20 }
 0x10f   : > { %2542 = vmatprep.mubr.msk.bf16.mxu0 %vm925_vm0, %v3051_v23  ;;  %2574 = vmatprep.mubr.msk.bf16.mxu1 %vm925_vm0, %v3053_v24 }
 0x111   : > { %v1175_v29 = vpop.f32.mrb[8].mxu0  ;;  %v1431_v30 = vpop.f32.mrb[8].mxu1 }
 0x112   : > { %v2713_v31 = vpack.c.bf16 %v1175_v29, %v1175_v29  ;;  %v2777_v32 = vpack.c.bf16 %v1431_v30, %v1431_v30  ;;  %v1177_v33 = vpop.f32.mrb[9].mxu0  ;;  %v1433_v34 = vpop.f32.mrb[9].mxu1 }
 0x113   : > { %v1178_v37 = vpop.f32.mrb[10].mxu0  ;;  %v1434_v38 = vpop.f32.mrb[10].mxu1 }
 0x114   : > { %2187 = vst.msk [vmem:[%s3310_s12 + $0x10] sm:$0xf] %vm2182_vm3, %v2713_v31  ;;  %2251 = vst.msk [vmem:[%s3310_s12 + $0x110] sm:$0xf] %vm2182_vm3, %v2777_v32  ;;  %v2714_v41 = vpack.c.bf16 %v1178_v37, %v1178_v37  ;;  %v2778_v42 = vpack.c.bf16 %v1434_v38, %v1434_v38  ;;  %v1180_v43 = vpop.f32.mrb[11].mxu0  ;;  %v1436_v44 = vpop.f32.mrb[11].mxu1 }
 0x116   : > { %2188 = vst.msk [vmem:[%s3310_s12 + $0x14] sm:$0xf] %vm2182_vm3, %v2714_v41  ;;  %2252 = vst.msk [vmem:[%s3310_s12 + $0x114] sm:$0xf] %vm2182_vm3, %v2778_v42  ;;  %1390 = vmatmul.mubr.bf16.gmra.mrb[116].mxu0 %v3055_v35  ;;  %1646 = vmatmul.mubr.bf16.gmra.mrb[116].mxu1 %v3056_v36 }
 0x117   : > { %2543 = vmatprep.mubr.msk.bf16.mxu0 %vm925_vm0, %v3057_v39  ;;  %2575 = vmatprep.mubr.msk.bf16.mxu1 %vm925_vm0, %v3059_v40 }
 0x119   : > { %v1183_v45 = vpop.f32.mrb[12].mxu0  ;;  %v1439_v46 = vpop.f32.mrb[12].mxu1 }
 0x11a   : > { %v2715_v47 = vpack.c.bf16 %v1183_v45, %v1183_v45  ;;  %v2779_v48 = vpack.c.bf16 %v1439_v46, %v1439_v46  ;;  %v1185_v49 = vpop.f32.mrb[13].mxu0  ;;  %v1441_v50 = vpop.f32.mrb[13].mxu1 }
 0x11b   : > { %v1186_v53 = vpop.f32.mrb[14].mxu0  ;;  %v1442_v54 = vpop.f32.mrb[14].mxu1 }
 0x11c   : > { %2189 = vst.msk [vmem:[%s3310_s12 + $0x18] sm:$0xf] %vm2182_vm3, %v2715_v47  ;;  %2253 = vst.msk [vmem:[%s3310_s12 + $0x118] sm:$0xf] %vm2182_vm3, %v2779_v48  ;;  %v2716_v57 = vpack.c.bf16 %v1186_v53, %v1186_v53  ;;  %v2780_v58 = vpack.c.bf16 %v1442_v54, %v1442_v54  ;;  %v1188_v59 = vpop.f32.mrb[15].mxu0  ;;  %v1444_v60 = vpop.f32.mrb[15].mxu1 }
 0x11e   : > { %2190 = vst.msk [vmem:[%s3310_s12 + $0x1c] sm:$0xf] %vm2182_vm3, %v2716_v57  ;;  %2254 = vst.msk [vmem:[%s3310_s12 + $0x11c] sm:$0xf] %vm2182_vm3, %v2780_v58  ;;  %1398 = vmatmul.mubr.bf16.gmra.mrb[120].mxu0 %v3061_v51  ;;  %1654 = vmatmul.mubr.bf16.gmra.mrb[120].mxu1 %v3062_v52 }
 0x11f   : > { %2544 = vmatprep.mubr.msk.bf16.mxu0 %vm925_vm0, %v3063_v55  ;;  %2576 = vmatprep.mubr.msk.bf16.mxu1 %vm925_vm0, %v3065_v56 }
 0x121   : > { %v1191_v61 = vpop.f32.mrb[16].mxu0  ;;  %v1447_v62 = vpop.f32.mrb[16].mxu1 }
 0x122   : > { %v2717_v63 = vpack.c.bf16 %v1191_v61, %v1191_v61  ;;  %v2781_v0 = vpack.c.bf16 %v1447_v62, %v1447_v62  ;;  %v1193_v1 = vpop.f32.mrb[17].mxu0  ;;  %v1449_v2 = vpop.f32.mrb[17].mxu1 }
 0x123   : > { %v1194_v5 = vpop.f32.mrb[18].mxu0  ;;  %v1450_v6 = vpop.f32.mrb[18].mxu1 }
 0x124   : > { %2191 = vst.msk [vmem:[%s3310_s12 + $0x20] sm:$0xf] %vm2182_vm3, %v2717_v63  ;;  %2255 = vst.msk [vmem:[%s3310_s12 + $0x120] sm:$0xf] %vm2182_vm3, %v2781_v0  ;;  %v2718_v7 = vpack.c.bf16 %v1194_v5, %v1194_v5  ;;  %v2782_v8 = vpack.c.bf16 %v1450_v6, %v1450_v6  ;;  %v1196_v9 = vpop.f32.mrb[19].mxu0  ;;  %v1452_v10 = vpop.f32.mrb[19].mxu1 }
 0x126   : > { %2192 = vst.msk [vmem:[%s3310_s12 + $0x24] sm:$0xf] %vm2182_vm3, %v2718_v7  ;;  %2256 = vst.msk [vmem:[%s3310_s12 + $0x124] sm:$0xf] %vm2182_vm3, %v2782_v8  ;;  %1406 = vmatmul.mubr.bf16.gmra.mrb[124].mxu0 %v3067_v3  ;;  %1662 = vmatmul.mubr.bf16.gmra.mrb[124].mxu1 %v3068_v4 }
 0x129   : > { %v1199_v11 = vpop.f32.mrb[20].mxu0  ;;  %v1455_v12 = vpop.f32.mrb[20].mxu1 }
 0x12a   : > { %v2719_v13 = vpack.c.bf16 %v1199_v11, %v1199_v11  ;;  %v2783_v14 = vpack.c.bf16 %v1455_v12, %v1455_v12  ;;  %v1201_v15 = vpop.f32.mrb[21].mxu0  ;;  %v1457_v16 = vpop.f32.mrb[21].mxu1 }
 0x12b   : > { %v1202_v17 = vpop.f32.mrb[22].mxu0  ;;  %v1458_v18 = vpop.f32.mrb[22].mxu1 }
 0x12c   : > { %2193 = vst.msk [vmem:[%s3310_s12 + $0x28] sm:$0xf] %vm2182_vm3, %v2719_v13  ;;  %2257 = vst.msk [vmem:[%s3310_s12 + $0x128] sm:$0xf] %vm2182_vm3, %v2783_v14  ;;  %v2720_v19 = vpack.c.bf16 %v1202_v17, %v1202_v17  ;;  %v2784_v20 = vpack.c.bf16 %v1458_v18, %v1458_v18  ;;  %v1204_v21 = vpop.f32.mrb[23].mxu0  ;;  %v1460_v22 = vpop.f32.mrb[23].mxu1 }
 0x12e   : > { %2194 = vst.msk [vmem:[%s3310_s12 + $0x2c] sm:$0xf] %vm2182_vm3, %v2720_v19  ;;  %2258 = vst.msk [vmem:[%s3310_s12 + $0x12c] sm:$0xf] %vm2182_vm3, %v2784_v20 }
 0x131   : > { %v1207_v23 = vpop.f32.mrb[24].mxu0  ;;  %v1463_v24 = vpop.f32.mrb[24].mxu1 }
 0x132   : > { %v2721_v25 = vpack.c.bf16 %v1207_v23, %v1207_v23  ;;  %v2785_v26 = vpack.c.bf16 %v1463_v24, %v1463_v24  ;;  %v1209_v27 = vpop.f32.mrb[25].mxu0  ;;  %v1465_v28 = vpop.f32.mrb[25].mxu1 }
 0x133   : > { %v1210_v29 = vpop.f32.mrb[26].mxu0  ;;  %v1466_v30 = vpop.f32.mrb[26].mxu1 }
 0x134   : > { %2195 = vst.msk [vmem:[%s3310_s12 + $0x30] sm:$0xf] %vm2182_vm3, %v2721_v25  ;;  %2259 = vst.msk [vmem:[%s3310_s12 + $0x130] sm:$0xf] %vm2182_vm3, %v2785_v26  ;;  %v2722_v31 = vpack.c.bf16 %v1210_v29, %v1210_v29  ;;  %v2786_v32 = vpack.c.bf16 %v1466_v30, %v1466_v30  ;;  %v1212_v33 = vpop.f32.mrb[27].mxu0  ;;  %v1468_v34 = vpop.f32.mrb[27].mxu1 }
 0x136   : > { %2196 = vst.msk [vmem:[%s3310_s12 + $0x34] sm:$0xf] %vm2182_vm3, %v2722_v31  ;;  %2260 = vst.msk [vmem:[%s3310_s12 + $0x134] sm:$0xf] %vm2182_vm3, %v2786_v32 }
 0x139   : > { %v1215_v35 = vpop.f32.mrb[28].mxu0  ;;  %v1471_v36 = vpop.f32.mrb[28].mxu1 }
 0x13a   : > { %v2723_v37 = vpack.c.bf16 %v1215_v35, %v1215_v35  ;;  %v2787_v38 = vpack.c.bf16 %v1471_v36, %v1471_v36  ;;  %v1217_v39 = vpop.f32.mrb[29].mxu0  ;;  %v1473_v40 = vpop.f32.mrb[29].mxu1 }
 0x13b   : > { %v1218_v41 = vpop.f32.mrb[30].mxu0  ;;  %v1474_v42 = vpop.f32.mrb[30].mxu1 }
 0x13c   : > { %2197 = vst.msk [vmem:[%s3310_s12 + $0x38] sm:$0xf] %vm2182_vm3, %v2723_v37  ;;  %2261 = vst.msk [vmem:[%s3310_s12 + $0x138] sm:$0xf] %vm2182_vm3, %v2787_v38  ;;  %v2724_v43 = vpack.c.bf16 %v1218_v41, %v1218_v41  ;;  %v2788_v44 = vpack.c.bf16 %v1474_v42, %v1474_v42  ;;  %v1220_v45 = vpop.f32.mrb[31].mxu0  ;;  %v1476_v46 = vpop.f32.mrb[31].mxu1 }
 0x13e   : > { %2198 = vst.msk [vmem:[%s3310_s12 + $0x3c] sm:$0xf] %vm2182_vm3, %v2724_v43  ;;  %2262 = vst.msk [vmem:[%s3310_s12 + $0x13c] sm:$0xf] %vm2182_vm3, %v2788_v44 }
 0x141   : > { %v1223_v47 = vpop.f32.mrb[32].mxu0  ;;  %v1479_v48 = vpop.f32.mrb[32].mxu1 }
 0x142   : > { %v2725_v49 = vpack.c.bf16 %v1223_v47, %v1223_v47  ;;  %v2789_v50 = vpack.c.bf16 %v1479_v48, %v1479_v48  ;;  %v1225_v51 = vpop.f32.mrb[33].mxu0  ;;  %v1481_v52 = vpop.f32.mrb[33].mxu1 }
 0x143   : > { %v1226_v53 = vpop.f32.mrb[34].mxu0  ;;  %v1482_v54 = vpop.f32.mrb[34].mxu1 }
 0x144   : > { %2199 = vst.msk [vmem:[%s3310_s12 + $0x40] sm:$0xf] %vm2182_vm3, %v2725_v49  ;;  %2263 = vst.msk [vmem:[%s3310_s12 + $0x140] sm:$0xf] %vm2182_vm3, %v2789_v50  ;;  %v2726_v55 = vpack.c.bf16 %v1226_v53, %v1226_v53  ;;  %v2790_v56 = vpack.c.bf16 %v1482_v54, %v1482_v54  ;;  %v1228_v57 = vpop.f32.mrb[35].mxu0  ;;  %v1484_v58 = vpop.f32.mrb[35].mxu1 }
 0x146   : > { %2200 = vst.msk [vmem:[%s3310_s12 + $0x44] sm:$0xf] %vm2182_vm3, %v2726_v55  ;;  %2264 = vst.msk [vmem:[%s3310_s12 + $0x144] sm:$0xf] %vm2182_vm3, %v2790_v56 }
 0x149   : > { %v1231_v59 = vpop.f32.mrb[36].mxu0  ;;  %v1487_v60 = vpop.f32.mrb[36].mxu1 }
 0x14a   : > { %v2727_v61 = vpack.c.bf16 %v1231_v59, %v1231_v59  ;;  %v2791_v62 = vpack.c.bf16 %v1487_v60, %v1487_v60  ;;  %v1233_v63 = vpop.f32.mrb[37].mxu0  ;;  %v1489_v0 = vpop.f32.mrb[37].mxu1 }
 0x14b   : > { %v1234_v1 = vpop.f32.mrb[38].mxu0  ;;  %v1490_v2 = vpop.f32.mrb[38].mxu1 }
 0x14c   : > { %2201 = vst.msk [vmem:[%s3310_s12 + $0x48] sm:$0xf] %vm2182_vm3, %v2727_v61  ;;  %2265 = vst.msk [vmem:[%s3310_s12 + $0x148] sm:$0xf] %vm2182_vm3, %v2791_v62  ;;  %v2728_v3 = vpack.c.bf16 %v1234_v1, %v1234_v1  ;;  %v2792_v4 = vpack.c.bf16 %v1490_v2, %v1490_v2  ;;  %v1236_v5 = vpop.f32.mrb[39].mxu0  ;;  %v1492_v6 = vpop.f32.mrb[39].mxu1 }
 0x14e   : > { %2202 = vst.msk [vmem:[%s3310_s12 + $0x4c] sm:$0xf] %vm2182_vm3, %v2728_v3  ;;  %2266 = vst.msk [vmem:[%s3310_s12 + $0x14c] sm:$0xf] %vm2182_vm3, %v2792_v4 }
 0x151   : > { %v1239_v7 = vpop.f32.mrb[40].mxu0  ;;  %v1495_v8 = vpop.f32.mrb[40].mxu1 }
 0x152   : > { %v2729_v9 = vpack.c.bf16 %v1239_v7, %v1239_v7  ;;  %v2793_v10 = vpack.c.bf16 %v1495_v8, %v1495_v8  ;;  %v1241_v11 = vpop.f32.mrb[41].mxu0  ;;  %v1497_v12 = vpop.f32.mrb[41].mxu1 }
 0x153   : > { %v1242_v13 = vpop.f32.mrb[42].mxu0  ;;  %v1498_v14 = vpop.f32.mrb[42].mxu1 }
 0x154   : > { %2203 = vst.msk [vmem:[%s3310_s12 + $0x50] sm:$0xf] %vm2182_vm3, %v2729_v9  ;;  %2267 = vst.msk [vmem:[%s3310_s12 + $0x150] sm:$0xf] %vm2182_vm3, %v2793_v10  ;;  %v2730_v15 = vpack.c.bf16 %v1242_v13, %v1242_v13  ;;  %v2794_v16 = vpack.c.bf16 %v1498_v14, %v1498_v14  ;;  %v1244_v17 = vpop.f32.mrb[43].mxu0  ;;  %v1500_v18 = vpop.f32.mrb[43].mxu1 }
 0x156   : > { %2204 = vst.msk [vmem:[%s3310_s12 + $0x54] sm:$0xf] %vm2182_vm3, %v2730_v15  ;;  %2268 = vst.msk [vmem:[%s3310_s12 + $0x154] sm:$0xf] %vm2182_vm3, %v2794_v16 }
 0x159   : > { %v1247_v19 = vpop.f32.mrb[44].mxu0  ;;  %v1503_v20 = vpop.f32.mrb[44].mxu1 }
 0x15a   : > { %v2731_v21 = vpack.c.bf16 %v1247_v19, %v1247_v19  ;;  %v2795_v22 = vpack.c.bf16 %v1503_v20, %v1503_v20  ;;  %v1249_v23 = vpop.f32.mrb[45].mxu0  ;;  %v1505_v24 = vpop.f32.mrb[45].mxu1 }
 0x15b   : > { %v1250_v25 = vpop.f32.mrb[46].mxu0  ;;  %v1506_v26 = vpop.f32.mrb[46].mxu1 }
 0x15c   : > { %2205 = vst.msk [vmem:[%s3310_s12 + $0x58] sm:$0xf] %vm2182_vm3, %v2731_v21  ;;  %2269 = vst.msk [vmem:[%s3310_s12 + $0x158] sm:$0xf] %vm2182_vm3, %v2795_v22  ;;  %v2732_v27 = vpack.c.bf16 %v1250_v25, %v1250_v25  ;;  %v2796_v28 = vpack.c.bf16 %v1506_v26, %v1506_v26  ;;  %v1252_v29 = vpop.f32.mrb[47].mxu0  ;;  %v1508_v30 = vpop.f32.mrb[47].mxu1 }
 0x15e   : > { %2206 = vst.msk [vmem:[%s3310_s12 + $0x5c] sm:$0xf] %vm2182_vm3, %v2732_v27  ;;  %2270 = vst.msk [vmem:[%s3310_s12 + $0x15c] sm:$0xf] %vm2182_vm3, %v2796_v28 }
 0x161   : > { %v1255_v31 = vpop.f32.mrb[48].mxu0  ;;  %v1511_v32 = vpop.f32.mrb[48].mxu1 }
 0x162   : > { %v2733_v33 = vpack.c.bf16 %v1255_v31, %v1255_v31  ;;  %v2797_v34 = vpack.c.bf16 %v1511_v32, %v1511_v32  ;;  %v1257_v35 = vpop.f32.mrb[49].mxu0  ;;  %v1513_v36 = vpop.f32.mrb[49].mxu1 }
 0x163   : > { %v1258_v37 = vpop.f32.mrb[50].mxu0  ;;  %v1514_v38 = vpop.f32.mrb[50].mxu1 }
 0x164   : > { %2207 = vst.msk [vmem:[%s3310_s12 + $0x60] sm:$0xf] %vm2182_vm3, %v2733_v33  ;;  %2271 = vst.msk [vmem:[%s3310_s12 + $0x160] sm:$0xf] %vm2182_vm3, %v2797_v34  ;;  %v2734_v39 = vpack.c.bf16 %v1258_v37, %v1258_v37  ;;  %v2798_v40 = vpack.c.bf16 %v1514_v38, %v1514_v38  ;;  %v1260_v41 = vpop.f32.mrb[51].mxu0  ;;  %v1516_v42 = vpop.f32.mrb[51].mxu1 }
 0x166   : > { %2208 = vst.msk [vmem:[%s3310_s12 + $0x64] sm:$0xf] %vm2182_vm3, %v2734_v39  ;;  %2272 = vst.msk [vmem:[%s3310_s12 + $0x164] sm:$0xf] %vm2182_vm3, %v2798_v40 }
 0x169   : > { %v1263_v43 = vpop.f32.mrb[52].mxu0  ;;  %v1519_v44 = vpop.f32.mrb[52].mxu1 }
 0x16a   : > { %v2735_v45 = vpack.c.bf16 %v1263_v43, %v1263_v43  ;;  %v2799_v46 = vpack.c.bf16 %v1519_v44, %v1519_v44  ;;  %v1265_v47 = vpop.f32.mrb[53].mxu0  ;;  %v1521_v48 = vpop.f32.mrb[53].mxu1 }
 0x16b   : > { %v1266_v49 = vpop.f32.mrb[54].mxu0  ;;  %v1522_v50 = vpop.f32.mrb[54].mxu1 }
 0x16c   : > { %2209 = vst.msk [vmem:[%s3310_s12 + $0x68] sm:$0xf] %vm2182_vm3, %v2735_v45  ;;  %2273 = vst.msk [vmem:[%s3310_s12 + $0x168] sm:$0xf] %vm2182_vm3, %v2799_v46  ;;  %v2736_v51 = vpack.c.bf16 %v1266_v49, %v1266_v49  ;;  %v2800_v52 = vpack.c.bf16 %v1522_v50, %v1522_v50  ;;  %v1268_v53 = vpop.f32.mrb[55].mxu0  ;;  %v1524_v54 = vpop.f32.mrb[55].mxu1 }
 0x16e   : > { %2210 = vst.msk [vmem:[%s3310_s12 + $0x6c] sm:$0xf] %vm2182_vm3, %v2736_v51  ;;  %2274 = vst.msk [vmem:[%s3310_s12 + $0x16c] sm:$0xf] %vm2182_vm3, %v2800_v52 }
 0x171   : > { %v1271_v55 = vpop.f32.mrb[56].mxu0  ;;  %v1527_v56 = vpop.f32.mrb[56].mxu1 }
 0x172   : > { %v2737_v57 = vpack.c.bf16 %v1271_v55, %v1271_v55  ;;  %v2801_v58 = vpack.c.bf16 %v1527_v56, %v1527_v56  ;;  %v1273_v59 = vpop.f32.mrb[57].mxu0  ;;  %v1529_v60 = vpop.f32.mrb[57].mxu1 }
 0x173   : > { %v1274_v61 = vpop.f32.mrb[58].mxu0  ;;  %v1530_v62 = vpop.f32.mrb[58].mxu1 }
 0x174   : > { %2211 = vst.msk [vmem:[%s3310_s12 + $0x70] sm:$0xf] %vm2182_vm3, %v2737_v57  ;;  %2275 = vst.msk [vmem:[%s3310_s12 + $0x170] sm:$0xf] %vm2182_vm3, %v2801_v58  ;;  %v2738_v63 = vpack.c.bf16 %v1274_v61, %v1274_v61  ;;  %v2802_v0 = vpack.c.bf16 %v1530_v62, %v1530_v62  ;;  %v1276_v1 = vpop.f32.mrb[59].mxu0  ;;  %v1532_v2 = vpop.f32.mrb[59].mxu1 }
 0x176   : > { %2212 = vst.msk [vmem:[%s3310_s12 + $0x74] sm:$0xf] %vm2182_vm3, %v2738_v63  ;;  %2276 = vst.msk [vmem:[%s3310_s12 + $0x174] sm:$0xf] %vm2182_vm3, %v2802_v0 }
 0x179   : > { %v1279_v3 = vpop.f32.mrb[60].mxu0  ;;  %v1535_v4 = vpop.f32.mrb[60].mxu1 }
 0x17a   : > { %v2739_v5 = vpack.c.bf16 %v1279_v3, %v1279_v3  ;;  %v2803_v6 = vpack.c.bf16 %v1535_v4, %v1535_v4  ;;  %v1281_v7 = vpop.f32.mrb[61].mxu0  ;;  %v1537_v8 = vpop.f32.mrb[61].mxu1 }
 0x17b   : > { %v1282_v9 = vpop.f32.mrb[62].mxu0  ;;  %v1538_v10 = vpop.f32.mrb[62].mxu1 }
 0x17c   : > { %2213 = vst.msk [vmem:[%s3310_s12 + $0x78] sm:$0xf] %vm2182_vm3, %v2739_v5  ;;  %2277 = vst.msk [vmem:[%s3310_s12 + $0x178] sm:$0xf] %vm2182_vm3, %v2803_v6  ;;  %v2740_v11 = vpack.c.bf16 %v1282_v9, %v1282_v9  ;;  %v2804_v12 = vpack.c.bf16 %v1538_v10, %v1538_v10  ;;  %v1284_v13 = vpop.f32.mrb[63].mxu0  ;;  %v1540_v14 = vpop.f32.mrb[63].mxu1 }
 0x17e   : > { %2214 = vst.msk [vmem:[%s3310_s12 + $0x7c] sm:$0xf] %vm2182_vm3, %v2740_v11  ;;  %2278 = vst.msk [vmem:[%s3310_s12 + $0x17c] sm:$0xf] %vm2182_vm3, %v2804_v12 }
 0x181   : > { %v1287_v15 = vpop.f32.mrb[64].mxu0  ;;  %v1543_v16 = vpop.f32.mrb[64].mxu1 }
 0x182   : > { %v2741_v17 = vpack.c.bf16 %v1287_v15, %v1287_v15  ;;  %v2805_v18 = vpack.c.bf16 %v1543_v16, %v1543_v16  ;;  %v1289_v19 = vpop.f32.mrb[65].mxu0  ;;  %v1545_v20 = vpop.f32.mrb[65].mxu1 }
 0x183   : > { %v1290_v21 = vpop.f32.mrb[66].mxu0  ;;  %v1546_v22 = vpop.f32.mrb[66].mxu1 }
 0x184   : > { %2215 = vst.msk [vmem:[%s3310_s12 + $0x80] sm:$0xf] %vm2182_vm3, %v2741_v17  ;;  %2279 = vst.msk [vmem:[%s3310_s12 + $0x180] sm:$0xf] %vm2182_vm3, %v2805_v18  ;;  %v2742_v23 = vpack.c.bf16 %v1290_v21, %v1290_v21  ;;  %v2806_v24 = vpack.c.bf16 %v1546_v22, %v1546_v22  ;;  %v1292_v25 = vpop.f32.mrb[67].mxu0  ;;  %v1548_v26 = vpop.f32.mrb[67].mxu1 }
 0x186   : > { %2216 = vst.msk [vmem:[%s3310_s12 + $0x84] sm:$0xf] %vm2182_vm3, %v2742_v23  ;;  %2280 = vst.msk [vmem:[%s3310_s12 + $0x184] sm:$0xf] %vm2182_vm3, %v2806_v24 }
 0x189   : > { %v1295_v27 = vpop.f32.mrb[68].mxu0  ;;  %v1551_v28 = vpop.f32.mrb[68].mxu1 }
 0x18a   : > { %v2743_v29 = vpack.c.bf16 %v1295_v27, %v1295_v27  ;;  %v2807_v30 = vpack.c.bf16 %v1551_v28, %v1551_v28  ;;  %v1297_v31 = vpop.f32.mrb[69].mxu0  ;;  %v1553_v32 = vpop.f32.mrb[69].mxu1 }
 0x18b   : > { %v1298_v33 = vpop.f32.mrb[70].mxu0  ;;  %v1554_v34 = vpop.f32.mrb[70].mxu1 }
 0x18c   : > { %2217 = vst.msk [vmem:[%s3310_s12 + $0x88] sm:$0xf] %vm2182_vm3, %v2743_v29  ;;  %2281 = vst.msk [vmem:[%s3310_s12 + $0x188] sm:$0xf] %vm2182_vm3, %v2807_v30  ;;  %v2744_v35 = vpack.c.bf16 %v1298_v33, %v1298_v33  ;;  %v2808_v36 = vpack.c.bf16 %v1554_v34, %v1554_v34  ;;  %v1300_v37 = vpop.f32.mrb[71].mxu0  ;;  %v1556_v38 = vpop.f32.mrb[71].mxu1 }
 0x18e   : > { %2218 = vst.msk [vmem:[%s3310_s12 + $0x8c] sm:$0xf] %vm2182_vm3, %v2744_v35  ;;  %2282 = vst.msk [vmem:[%s3310_s12 + $0x18c] sm:$0xf] %vm2182_vm3, %v2808_v36 }
 0x191   : > { %v1303_v39 = vpop.f32.mrb[72].mxu0  ;;  %v1559_v40 = vpop.f32.mrb[72].mxu1 }
 0x192   : > { %v2745_v41 = vpack.c.bf16 %v1303_v39, %v1303_v39  ;;  %v2809_v42 = vpack.c.bf16 %v1559_v40, %v1559_v40  ;;  %v1305_v43 = vpop.f32.mrb[73].mxu0  ;;  %v1561_v44 = vpop.f32.mrb[73].mxu1 }
 0x193   : > { %v1306_v45 = vpop.f32.mrb[74].mxu0  ;;  %v1562_v46 = vpop.f32.mrb[74].mxu1 }
 0x194   : > { %2219 = vst.msk [vmem:[%s3310_s12 + $0x90] sm:$0xf] %vm2182_vm3, %v2745_v41  ;;  %2283 = vst.msk [vmem:[%s3310_s12 + $0x190] sm:$0xf] %vm2182_vm3, %v2809_v42  ;;  %v2746_v47 = vpack.c.bf16 %v1306_v45, %v1306_v45  ;;  %v2810_v48 = vpack.c.bf16 %v1562_v46, %v1562_v46  ;;  %v1308_v49 = vpop.f32.mrb[75].mxu0  ;;  %v1564_v50 = vpop.f32.mrb[75].mxu1 }
 0x196   : > { %2220 = vst.msk [vmem:[%s3310_s12 + $0x94] sm:$0xf] %vm2182_vm3, %v2746_v47  ;;  %2284 = vst.msk [vmem:[%s3310_s12 + $0x194] sm:$0xf] %vm2182_vm3, %v2810_v48 }
 0x199   : > { %v1311_v51 = vpop.f32.mrb[76].mxu0  ;;  %v1567_v52 = vpop.f32.mrb[76].mxu1 }
 0x19a   : > { %v2747_v53 = vpack.c.bf16 %v1311_v51, %v1311_v51  ;;  %v2811_v54 = vpack.c.bf16 %v1567_v52, %v1567_v52  ;;  %v1313_v55 = vpop.f32.mrb[77].mxu0  ;;  %v1569_v56 = vpop.f32.mrb[77].mxu1 }
 0x19b   : > { %v1314_v57 = vpop.f32.mrb[78].mxu0  ;;  %v1570_v58 = vpop.f32.mrb[78].mxu1 }
 0x19c   : > { %2221 = vst.msk [vmem:[%s3310_s12 + $0x98] sm:$0xf] %vm2182_vm3, %v2747_v53  ;;  %2285 = vst.msk [vmem:[%s3310_s12 + $0x198] sm:$0xf] %vm2182_vm3, %v2811_v54  ;;  %v2748_v59 = vpack.c.bf16 %v1314_v57, %v1314_v57  ;;  %v2812_v60 = vpack.c.bf16 %v1570_v58, %v1570_v58  ;;  %v1316_v61 = vpop.f32.mrb[79].mxu0  ;;  %v1572_v62 = vpop.f32.mrb[79].mxu1 }
 0x19e   : > { %2222 = vst.msk [vmem:[%s3310_s12 + $0x9c] sm:$0xf] %vm2182_vm3, %v2748_v59  ;;  %2286 = vst.msk [vmem:[%s3310_s12 + $0x19c] sm:$0xf] %vm2182_vm3, %v2812_v60 }
 0x1a1   : > { %v1319_v63 = vpop.f32.mrb[80].mxu0  ;;  %v1575_v0 = vpop.f32.mrb[80].mxu1 }
 0x1a2   : > { %v2749_v1 = vpack.c.bf16 %v1319_v63, %v1319_v63  ;;  %v2813_v2 = vpack.c.bf16 %v1575_v0, %v1575_v0  ;;  %v1321_v3 = vpop.f32.mrb[81].mxu0  ;;  %v1577_v4 = vpop.f32.mrb[81].mxu1 }
 0x1a3   : > { %v1322_v5 = vpop.f32.mrb[82].mxu0  ;;  %v1578_v6 = vpop.f32.mrb[82].mxu1 }
 0x1a4   : > { %2223 = vst.msk [vmem:[%s3310_s12 + $0xa0] sm:$0xf] %vm2182_vm3, %v2749_v1  ;;  %2287 = vst.msk [vmem:[%s3310_s12 + $0x1a0] sm:$0xf] %vm2182_vm3, %v2813_v2  ;;  %v2750_v7 = vpack.c.bf16 %v1322_v5, %v1322_v5  ;;  %v2814_v8 = vpack.c.bf16 %v1578_v6, %v1578_v6  ;;  %v1324_v9 = vpop.f32.mrb[83].mxu0  ;;  %v1580_v10 = vpop.f32.mrb[83].mxu1 }
 0x1a6   : > { %2224 = vst.msk [vmem:[%s3310_s12 + $0xa4] sm:$0xf] %vm2182_vm3, %v2750_v7  ;;  %2288 = vst.msk [vmem:[%s3310_s12 + $0x1a4] sm:$0xf] %vm2182_vm3, %v2814_v8 }
 0x1a9   : > { %v1327_v11 = vpop.f32.mrb[84].mxu0  ;;  %v1583_v12 = vpop.f32.mrb[84].mxu1 }
 0x1aa   : > { %v2751_v13 = vpack.c.bf16 %v1327_v11, %v1327_v11  ;;  %v2815_v14 = vpack.c.bf16 %v1583_v12, %v1583_v12  ;;  %v1329_v15 = vpop.f32.mrb[85].mxu0  ;;  %v1585_v16 = vpop.f32.mrb[85].mxu1 }
 0x1ab   : > { %v1330_v17 = vpop.f32.mrb[86].mxu0  ;;  %v1586_v18 = vpop.f32.mrb[86].mxu1 }
 0x1ac   : > { %2225 = vst.msk [vmem:[%s3310_s12 + $0xa8] sm:$0xf] %vm2182_vm3, %v2751_v13  ;;  %2289 = vst.msk [vmem:[%s3310_s12 + $0x1a8] sm:$0xf] %vm2182_vm3, %v2815_v14  ;;  %v2752_v19 = vpack.c.bf16 %v1330_v17, %v1330_v17  ;;  %v2816_v20 = vpack.c.bf16 %v1586_v18, %v1586_v18  ;;  %v1332_v21 = vpop.f32.mrb[87].mxu0  ;;  %v1588_v22 = vpop.f32.mrb[87].mxu1 }
 0x1ae   : > { %2226 = vst.msk [vmem:[%s3310_s12 + $0xac] sm:$0xf] %vm2182_vm3, %v2752_v19  ;;  %2290 = vst.msk [vmem:[%s3310_s12 + $0x1ac] sm:$0xf] %vm2182_vm3, %v2816_v20 }
 0x1b1   : > { %v1335_v23 = vpop.f32.mrb[88].mxu0  ;;  %v1591_v24 = vpop.f32.mrb[88].mxu1 }
 0x1b2   : > { %v2753_v25 = vpack.c.bf16 %v1335_v23, %v1335_v23  ;;  %v2817_v26 = vpack.c.bf16 %v1591_v24, %v1591_v24  ;;  %v1337_v27 = vpop.f32.mrb[89].mxu0  ;;  %v1593_v28 = vpop.f32.mrb[89].mxu1 }
 0x1b3   : > { %v1338_v29 = vpop.f32.mrb[90].mxu0  ;;  %v1594_v30 = vpop.f32.mrb[90].mxu1 }
 0x1b4   : > { %2227 = vst.msk [vmem:[%s3310_s12 + $0xb0] sm:$0xf] %vm2182_vm3, %v2753_v25  ;;  %2291 = vst.msk [vmem:[%s3310_s12 + $0x1b0] sm:$0xf] %vm2182_vm3, %v2817_v26  ;;  %v2754_v31 = vpack.c.bf16 %v1338_v29, %v1338_v29  ;;  %v2818_v32 = vpack.c.bf16 %v1594_v30, %v1594_v30  ;;  %v1340_v33 = vpop.f32.mrb[91].mxu0  ;;  %v1596_v34 = vpop.f32.mrb[91].mxu1 }
 0x1b6   : > { %2228 = vst.msk [vmem:[%s3310_s12 + $0xb4] sm:$0xf] %vm2182_vm3, %v2754_v31  ;;  %2292 = vst.msk [vmem:[%s3310_s12 + $0x1b4] sm:$0xf] %vm2182_vm3, %v2818_v32 }
 0x1b9   : > { %v1343_v35 = vpop.f32.mrb[92].mxu0  ;;  %v1599_v36 = vpop.f32.mrb[92].mxu1 }
 0x1ba   : > { %v2755_v37 = vpack.c.bf16 %v1343_v35, %v1343_v35  ;;  %v2819_v38 = vpack.c.bf16 %v1599_v36, %v1599_v36  ;;  %v1345_v39 = vpop.f32.mrb[93].mxu0  ;;  %v1601_v40 = vpop.f32.mrb[93].mxu1 }
 0x1bb   : > { %v1346_v41 = vpop.f32.mrb[94].mxu0  ;;  %v1602_v42 = vpop.f32.mrb[94].mxu1 }
 0x1bc   : > { %2229 = vst.msk [vmem:[%s3310_s12 + $0xb8] sm:$0xf] %vm2182_vm3, %v2755_v37  ;;  %2293 = vst.msk [vmem:[%s3310_s12 + $0x1b8] sm:$0xf] %vm2182_vm3, %v2819_v38  ;;  %v2756_v43 = vpack.c.bf16 %v1346_v41, %v1346_v41  ;;  %v2820_v44 = vpack.c.bf16 %v1602_v42, %v1602_v42  ;;  %v1348_v45 = vpop.f32.mrb[95].mxu0  ;;  %v1604_v46 = vpop.f32.mrb[95].mxu1 }
 0x1be   : > { %2230 = vst.msk [vmem:[%s3310_s12 + $0xbc] sm:$0xf] %vm2182_vm3, %v2756_v43  ;;  %2294 = vst.msk [vmem:[%s3310_s12 + $0x1bc] sm:$0xf] %vm2182_vm3, %v2820_v44 }
 0x1c1   : > { %v1351_v47 = vpop.f32.mrb[96].mxu0  ;;  %v1607_v48 = vpop.f32.mrb[96].mxu1 }
 0x1c2   : > { %v2757_v49 = vpack.c.bf16 %v1351_v47, %v1351_v47  ;;  %v2821_v50 = vpack.c.bf16 %v1607_v48, %v1607_v48  ;;  %v1353_v51 = vpop.f32.mrb[97].mxu0  ;;  %v1609_v52 = vpop.f32.mrb[97].mxu1 }
 0x1c3   : > { %v1354_v53 = vpop.f32.mrb[98].mxu0  ;;  %v1610_v54 = vpop.f32.mrb[98].mxu1 }
 0x1c4   : > { %2231 = vst.msk [vmem:[%s3310_s12 + $0xc0] sm:$0xf] %vm2182_vm3, %v2757_v49  ;;  %2295 = vst.msk [vmem:[%s3310_s12 + $0x1c0] sm:$0xf] %vm2182_vm3, %v2821_v50  ;;  %v2758_v55 = vpack.c.bf16 %v1354_v53, %v1354_v53  ;;  %v2822_v56 = vpack.c.bf16 %v1610_v54, %v1610_v54  ;;  %v1356_v57 = vpop.f32.mrb[99].mxu0  ;;  %v1612_v58 = vpop.f32.mrb[99].mxu1 }
 0x1c6   : > { %2232 = vst.msk [vmem:[%s3310_s12 + $0xc4] sm:$0xf] %vm2182_vm3, %v2758_v55  ;;  %2296 = vst.msk [vmem:[%s3310_s12 + $0x1c4] sm:$0xf] %vm2182_vm3, %v2822_v56 }
 0x1c9   : > { %v1359_v59 = vpop.f32.mrb[100].mxu0  ;;  %v1615_v60 = vpop.f32.mrb[100].mxu1 }
 0x1ca   : > { %v2759_v61 = vpack.c.bf16 %v1359_v59, %v1359_v59  ;;  %v2823_v62 = vpack.c.bf16 %v1615_v60, %v1615_v60  ;;  %v1361_v63 = vpop.f32.mrb[101].mxu0  ;;  %v1617_v0 = vpop.f32.mrb[101].mxu1 }
 0x1cb   : > { %v1362_v1 = vpop.f32.mrb[102].mxu0  ;;  %v1618_v2 = vpop.f32.mrb[102].mxu1 }
 0x1cc   : > { %2233 = vst.msk [vmem:[%s3310_s12 + $0xc8] sm:$0xf] %vm2182_vm3, %v2759_v61  ;;  %2297 = vst.msk [vmem:[%s3310_s12 + $0x1c8] sm:$0xf] %vm2182_vm3, %v2823_v62  ;;  %v2760_v3 = vpack.c.bf16 %v1362_v1, %v1362_v1  ;;  %v2824_v4 = vpack.c.bf16 %v1618_v2, %v1618_v2  ;;  %v1364_v5 = vpop.f32.mrb[103].mxu0  ;;  %v1620_v6 = vpop.f32.mrb[103].mxu1 }
 0x1ce   : > { %2234 = vst.msk [vmem:[%s3310_s12 + $0xcc] sm:$0xf] %vm2182_vm3, %v2760_v3  ;;  %2298 = vst.msk [vmem:[%s3310_s12 + $0x1cc] sm:$0xf] %vm2182_vm3, %v2824_v4 }
 0x1d1   : > { %v1367_v7 = vpop.f32.mrb[104].mxu0  ;;  %v1623_v8 = vpop.f32.mrb[104].mxu1 }
 0x1d2   : > { %v2761_v9 = vpack.c.bf16 %v1367_v7, %v1367_v7  ;;  %v2825_v10 = vpack.c.bf16 %v1623_v8, %v1623_v8  ;;  %v1369_v11 = vpop.f32.mrb[105].mxu0  ;;  %v1625_v12 = vpop.f32.mrb[105].mxu1 }
 0x1d3   : > { %v1370_v13 = vpop.f32.mrb[106].mxu0  ;;  %v1626_v14 = vpop.f32.mrb[106].mxu1 }
 0x1d4   : > { %2235 = vst.msk [vmem:[%s3310_s12 + $0xd0] sm:$0xf] %vm2182_vm3, %v2761_v9  ;;  %2299 = vst.msk [vmem:[%s3310_s12 + $0x1d0] sm:$0xf] %vm2182_vm3, %v2825_v10  ;;  %v2762_v15 = vpack.c.bf16 %v1370_v13, %v1370_v13  ;;  %v2826_v16 = vpack.c.bf16 %v1626_v14, %v1626_v14  ;;  %v1372_v17 = vpop.f32.mrb[107].mxu0  ;;  %v1628_v18 = vpop.f32.mrb[107].mxu1 }
 0x1d6   : > { %2236 = vst.msk [vmem:[%s3310_s12 + $0xd4] sm:$0xf] %vm2182_vm3, %v2762_v15  ;;  %2300 = vst.msk [vmem:[%s3310_s12 + $0x1d4] sm:$0xf] %vm2182_vm3, %v2826_v16 }
 0x1d9   : > { %v1375_v19 = vpop.f32.mrb[108].mxu0  ;;  %v1631_v20 = vpop.f32.mrb[108].mxu1 }
 0x1da   : > { %v2763_v21 = vpack.c.bf16 %v1375_v19, %v1375_v19  ;;  %v2827_v22 = vpack.c.bf16 %v1631_v20, %v1631_v20  ;;  %v1377_v23 = vpop.f32.mrb[109].mxu0  ;;  %v1633_v24 = vpop.f32.mrb[109].mxu1 }
 0x1db   : > { %v1378_v25 = vpop.f32.mrb[110].mxu0  ;;  %v1634_v26 = vpop.f32.mrb[110].mxu1 }
 0x1dc   : > { %2237 = vst.msk [vmem:[%s3310_s12 + $0xd8] sm:$0xf] %vm2182_vm3, %v2763_v21  ;;  %2301 = vst.msk [vmem:[%s3310_s12 + $0x1d8] sm:$0xf] %vm2182_vm3, %v2827_v22  ;;  %v2764_v27 = vpack.c.bf16 %v1378_v25, %v1378_v25  ;;  %v2828_v28 = vpack.c.bf16 %v1634_v26, %v1634_v26  ;;  %v1380_v29 = vpop.f32.mrb[111].mxu0  ;;  %v1636_v30 = vpop.f32.mrb[111].mxu1 }
 0x1de   : > { %2238 = vst.msk [vmem:[%s3310_s12 + $0xdc] sm:$0xf] %vm2182_vm3, %v2764_v27  ;;  %2302 = vst.msk [vmem:[%s3310_s12 + $0x1dc] sm:$0xf] %vm2182_vm3, %v2828_v28 }
 0x1e1   : > { %v1383_v31 = vpop.f32.mrb[112].mxu0  ;;  %v1639_v32 = vpop.f32.mrb[112].mxu1 }
 0x1e2   : > { %v2765_v33 = vpack.c.bf16 %v1383_v31, %v1383_v31  ;;  %v2829_v34 = vpack.c.bf16 %v1639_v32, %v1639_v32  ;;  %v1385_v35 = vpop.f32.mrb[113].mxu0  ;;  %v1641_v36 = vpop.f32.mrb[113].mxu1 }
 0x1e3   : > { %v1386_v37 = vpop.f32.mrb[114].mxu0  ;;  %v1642_v38 = vpop.f32.mrb[114].mxu1 }
 0x1e4   : > { %2239 = vst.msk [vmem:[%s3310_s12 + $0xe0] sm:$0xf] %vm2182_vm3, %v2765_v33  ;;  %2303 = vst.msk [vmem:[%s3310_s12 + $0x1e0] sm:$0xf] %vm2182_vm3, %v2829_v34  ;;  %v2766_v39 = vpack.c.bf16 %v1386_v37, %v1386_v37  ;;  %v2830_v40 = vpack.c.bf16 %v1642_v38, %v1642_v38  ;;  %v1388_v41 = vpop.f32.mrb[115].mxu0  ;;  %v1644_v42 = vpop.f32.mrb[115].mxu1 }
 0x1e6   : > { %2240 = vst.msk [vmem:[%s3310_s12 + $0xe4] sm:$0xf] %vm2182_vm3, %v2766_v39  ;;  %2304 = vst.msk [vmem:[%s3310_s12 + $0x1e4] sm:$0xf] %vm2182_vm3, %v2830_v40 }
 0x1e9   : > { %v1391_v43 = vpop.f32.mrb[116].mxu0  ;;  %v1647_v44 = vpop.f32.mrb[116].mxu1 }
 0x1ea   : > { %v2767_v45 = vpack.c.bf16 %v1391_v43, %v1391_v43  ;;  %v2831_v46 = vpack.c.bf16 %v1647_v44, %v1647_v44  ;;  %v1393_v47 = vpop.f32.mrb[117].mxu0  ;;  %v1649_v48 = vpop.f32.mrb[117].mxu1 }
 0x1eb   : > { %v1394_v49 = vpop.f32.mrb[118].mxu0  ;;  %v1650_v50 = vpop.f32.mrb[118].mxu1 }
 0x1ec   : > { %2241 = vst.msk [vmem:[%s3310_s12 + $0xe8] sm:$0xf] %vm2182_vm3, %v2767_v45  ;;  %2305 = vst.msk [vmem:[%s3310_s12 + $0x1e8] sm:$0xf] %vm2182_vm3, %v2831_v46  ;;  %v2768_v51 = vpack.c.bf16 %v1394_v49, %v1394_v49  ;;  %v2832_v52 = vpack.c.bf16 %v1650_v50, %v1650_v50  ;;  %v1396_v53 = vpop.f32.mrb[119].mxu0  ;;  %v1652_v54 = vpop.f32.mrb[119].mxu1 }
 0x1ee   : > { %2242 = vst.msk [vmem:[%s3310_s12 + $0xec] sm:$0xf] %vm2182_vm3, %v2768_v51  ;;  %2306 = vst.msk [vmem:[%s3310_s12 + $0x1ec] sm:$0xf] %vm2182_vm3, %v2832_v52 }
 0x1f1   : > { %v1399_v55 = vpop.f32.mrb[120].mxu0  ;;  %v1655_v56 = vpop.f32.mrb[120].mxu1 }
 0x1f2   : > { %v2769_v57 = vpack.c.bf16 %v1399_v55, %v1399_v55  ;;  %v2833_v58 = vpack.c.bf16 %v1655_v56, %v1655_v56  ;;  %v1401_v59 = vpop.f32.mrb[121].mxu0  ;;  %v1657_v60 = vpop.f32.mrb[121].mxu1 }
 0x1f3   : > { %v1402_v61 = vpop.f32.mrb[122].mxu0  ;;  %v1658_v62 = vpop.f32.mrb[122].mxu1 }
 0x1f4   : > { %2243 = vst.msk [vmem:[%s3310_s12 + $0xf0] sm:$0xf] %vm2182_vm3, %v2769_v57  ;;  %2307 = vst.msk [vmem:[%s3310_s12 + $0x1f0] sm:$0xf] %vm2182_vm3, %v2833_v58  ;;  %v2770_v63 = vpack.c.bf16 %v1402_v61, %v1402_v61  ;;  %v2834_v0 = vpack.c.bf16 %v1658_v62, %v1658_v62  ;;  %v1404_v1 = vpop.f32.mrb[123].mxu0  ;;  %v1660_v2 = vpop.f32.mrb[123].mxu1 }
 0x1f6   : > { %2244 = vst.msk [vmem:[%s3310_s12 + $0xf4] sm:$0xf] %vm2182_vm3, %v2770_v63  ;;  %2308 = vst.msk [vmem:[%s3310_s12 + $0x1f4] sm:$0xf] %vm2182_vm3, %v2834_v0 }
 0x1f9   : > { %v1407_v3 = vpop.f32.mrb[124].mxu0  ;;  %v1663_v4 = vpop.f32.mrb[124].mxu1 }
 0x1fa   : > { %v2771_v5 = vpack.c.bf16 %v1407_v3, %v1407_v3  ;;  %v2835_v6 = vpack.c.bf16 %v1663_v4, %v1663_v4  ;;  %v1409_v7 = vpop.f32.mrb[125].mxu0  ;;  %v1665_v8 = vpop.f32.mrb[125].mxu1 }
 0x1fb   : > { %v1410_v9 = vpop.f32.mrb[126].mxu0  ;;  %v1666_v10 = vpop.f32.mrb[126].mxu1 }
 0x1fc   : > { %2245 = vst.msk [vmem:[%s3310_s12 + $0xf8] sm:$0xf] %vm2182_vm3, %v2771_v5  ;;  %2309 = vst.msk [vmem:[%s3310_s12 + $0x1f8] sm:$0xf] %vm2182_vm3, %v2835_v6  ;;  %v2772_v11 = vpack.c.bf16 %v1410_v9, %v1410_v9  ;;  %v2836_v12 = vpack.c.bf16 %v1666_v10, %v1666_v10  ;;  %v1412_v13 = vpop.f32.mrb[127].mxu0  ;;  %v1668_v14 = vpop.f32.mrb[127].mxu1 }
 0x1fe   : > { %2246 = vst.msk [vmem:[%s3310_s12 + $0xfc] sm:$0xf] %vm2182_vm3, %v2772_v11  ;;  %2310 = vst.msk [vmem:[%s3310_s12 + $0x1fc] sm:$0xf] %vm2182_vm3, %v2836_v12 }
 0x1ff PF: > { %s12_s9 = sadd.s32 1, %s3075_s9  }
 0x200   : > { %p9_p4 = scmp.ge.s32.totalorder %s12_s9, 4  }
 0x202   :  { %11 = sbr.rel (!%p9_p4) target bundleno = 1 (0x1), region = 58 }

</bundles_post_ra>
